<compile_context>
chip_gen: v7x
topology: tpu7x:2x2x1
jax: 0.10.0
libtpu: 0.0.40
codegen_flags: <defaults>
</compile_context>

<pallas_src>
import functools
import math

import jax
import jax.numpy as jnp
from jax import lax
from jax.experimental import pallas as pl
from jax.experimental.pallas import tpu as pltpu

LANE = 128


def _round_up(x, m):
    return ((x + m - 1) // m) * m


# ----------------------------- Pallas kernels ---------------------------------

def _matmul_bias_kernel(x_ref, w_ref, b_ref, o_ref, acc_ref, *, activation):
    @pl.when(pl.program_id(2) == 0)
    def _():
        acc_ref[...] = jnp.zeros_like(acc_ref)

    acc_ref[...] += jnp.dot(x_ref[...].astype(jnp.bfloat16), w_ref[...],
                            preferred_element_type=jnp.float32)

    @pl.when(pl.program_id(2) == pl.num_programs(2) - 1)
    def _():
        acc = acc_ref[...] + b_ref[...]
        if activation == "relu":
            acc = jnp.maximum(acc, 0.0)
        o_ref[...] = acc.astype(o_ref.dtype)


def matmul_bias(x, w, b, activation="none", tm=256, tn=256, tk=512):
    """Tiled (M,N,K) matmul + bias (+ReLU).  x: f32, w: bf16, b: f32 [1,N].

    Tiles fall back to the full dim when it does not divide evenly (the demo
    shapes are tiny, so they use a single block per M/N and tile only K)."""
    m, k = x.shape
    k2, n = w.shape
    assert k == k2 and b.shape == (1, n)
    bm = tm if m % tm == 0 else m
    bn = tn if n % tn == 0 else n
    bk = tk if k % tk == 0 else k
    return pl.pallas_call(
        functools.partial(_matmul_bias_kernel, activation=activation),
        out_shape=jax.ShapeDtypeStruct((m, n), jnp.float32),
        grid=(m // bm, n // bn, k // bk),
        in_specs=[
            pl.BlockSpec((bm, bk), lambda i, j, kk: (i, kk)),
            pl.BlockSpec((bk, bn), lambda i, j, kk: (kk, j)),
            pl.BlockSpec((1, bn), lambda i, j, kk: (0, j)),
        ],
        out_specs=pl.BlockSpec((bm, bn), lambda i, j, kk: (i, j)),
        scratch_shapes=[pltpu.VMEM((bm, bn), jnp.float32)],
        compiler_params=pltpu.CompilerParams(
            dimension_semantics=("parallel", "parallel", "arbitrary")),
    )(x, w, b)


def _masked_layernorm(x, g, b, mask, n_real, eps):
    # LayerNorm over the *real* hidden lanes only (padded lanes stay zero).
    xm = x * mask
    mu = jnp.sum(xm, axis=-1, keepdims=True) / n_real
    d = (x - mu) * mask
    var = jnp.sum(d * d, axis=-1, keepdims=True) / n_real
    return d * lax.rsqrt(var + eps) * g + b


def _encoder_layer_kernel(x_ref, mask_ref, wqkv_ref, bqkv_ref, wo_ref, bo_ref,
                          ln1g_ref, ln1b_ref, w1_ref, b1_ref, w2_ref, b2_ref,
                          ln2g_ref, ln2b_ref, o_ref,
                          *, n_head, dh_pad, hidden, eps):
    """Whole post-LN encoder layer for one batch element (all heads fused).

    The 1/sqrt(d_head) scale is pre-folded into the Q weights (prepare_params).
    """
    x = x_ref[0]                                     # [T, HP] f32 residual stream
    mask = mask_ref[...]                             # [1, HP]
    hph = n_head * dh_pad

    # fused QKV projection (single lane-dense matmul, bf16 operands, f32 acc)
    qkv = jnp.dot(x.astype(jnp.bfloat16), wqkv_ref[...],
                  preferred_element_type=jnp.float32) + bqkv_ref[...]  # [T, 3*HPh]

    # all heads: per-head softmax, then one fused output projection
    heads = []
    for hh in range(n_head):                         # static unroll (n_head small)
        lo = hh * dh_pad
        hi = lo + dh_pad
        qh = qkv[:, lo:hi].astype(jnp.bfloat16)                  # scale pre-folded
        kh = qkv[:, hph + lo:hph + hi].astype(jnp.bfloat16)
        vh = qkv[:, 2 * hph + lo:2 * hph + hi].astype(jnp.bfloat16)
        s = lax.dot_general(qh, kh, (((1,), (1,)), ((), ())),
                            preferred_element_type=jnp.float32)  # [T, T]
        s = s - jnp.max(s, axis=-1, keepdims=True)
        p = jnp.exp(s)
        p = p * pl.reciprocal(jnp.sum(p, axis=-1, keepdims=True), approx=True)
        heads.append(jnp.dot(p.astype(jnp.bfloat16), vh,
                             preferred_element_type=jnp.float32))  # [T, dh_pad]
    oh_all = jnp.concatenate(heads, axis=-1).astype(jnp.bfloat16)  # [T, HPh]
    attn_proj = jnp.dot(oh_all, wo_ref[...],
                        preferred_element_type=jnp.float32)        # [T, HP]

    x1 = _masked_layernorm(attn_proj + bo_ref[...] + x,
                           ln1g_ref[...], ln1b_ref[...], mask, hidden, eps)

    # fused FFN (ReLU) + residual + LN; dff intermediate never leaves the kernel
    h1 = jnp.dot(x1.astype(jnp.bfloat16), w1_ref[...],
                 preferred_element_type=jnp.float32) + b1_ref[...]
    h1 = jnp.maximum(h1, 0.0)
    h2 = jnp.dot(h1.astype(jnp.bfloat16), w2_ref[...],
                 preferred_element_type=jnp.float32) + b2_ref[...]
    x2 = _masked_layernorm(h2 + x1, ln2g_ref[...], ln2b_ref[...], mask, hidden, eps)

    o_ref[0] = x2.astype(o_ref.dtype)


def transformer_layer(x, mask, lp, *, n_head, dh_pad, hidden, eps=1e-5):
    n, t, hp = x.shape

    def rep(a):
        nd = a.ndim
        return pl.BlockSpec(a.shape, lambda b, _nd=nd: (0,) * _nd)

    seq_spec = pl.BlockSpec((1, t, hp), lambda b: (b, 0, 0))
    ins = [x, mask, lp["wqkv"], lp["bqkv"], lp["wo"], lp["bo"],
           lp["ln1_g"], lp["ln1_b"], lp["w1"], lp["b1"], lp["w2"], lp["b2"],
           lp["ln2_g"], lp["ln2_b"]]
    return pl.pallas_call(
        functools.partial(_encoder_layer_kernel, n_head=n_head,
                          dh_pad=dh_pad, hidden=hidden, eps=eps),
        out_shape=jax.ShapeDtypeStruct((n, t, hp), jnp.float32),
        grid=(n,),
        in_specs=[seq_spec] + [rep(a) for a in ins[1:]],
        out_specs=seq_spec,
        compiler_params=pltpu.CompilerParams(dimension_semantics=("parallel",)),
    )(*ins)


# ----------------------------- full forward pass -------------------------------

@functools.partial(jax.jit, static_argnames=("n_head", "hidden", "vocab", "dh_pad"))
def temporal_aux_header(video_features, video_length, prep, *,
                        n_head, hidden, vocab, dh_pad):
    n, c, t, h, w = video_features.shape
    t_out = t // 4

    # Front end: AdaptiveAvgPool3d((-1,5,5)) + Conv3d(c->hidden,(1,5,5),pad(0,1,1))
    # + mean over the 3x3 conv output + AvgPool1d(4) over time, all folded into
    # the precomputed weight prep["w_front"]  ->  one lane-dense matmul.
    # TODO(synk): the reference Flatten(-2) + AvgPool1d(4) is shape-inconsistent
    # (4-D input to AvgPool1d); we resolve it by averaging the 3x3 conv output,
    # which is what the precomputed weight fold implements exactly.
    x = jnp.transpose(video_features, (0, 2, 1, 3, 4))[:, :t_out * 4]
    x = x.reshape(n * t_out, 4 * c * h * w)
    x = matmul_bias(x, prep["w_front"], prep["b_front"])           # [n*t_out, HP]
    x = x.reshape(n, t_out, -1)

    # Transformer encoder (post-LN, ReLU FFN): one fused pallas_call per layer.
    # TODO(synk): no src_key_padding_mask is derived from video_length (the
    # reference forward does not pass lengths to sequence_model either).
    for lp in prep["layers"]:
        x = transformer_layer(x, prep["mask"], lp, n_head=n_head,
                              dh_pad=dh_pad, hidden=hidden)

    # Final Linear(hidden -> vocab), vocab padded to 128 lanes, sliced at the end.
    logits = matmul_bias(x.reshape(n * t_out, -1), prep["fc_w"], prep["fc_b"])
    logits = logits.reshape(n, t_out, -1)[:, :, :vocab]

    new_length = video_length // 4
    return logits, new_length


# ---------------------- parameter folding / padding (once) ---------------------

def _adaptive_pool_matrix(in_size, out_size):
    """PyTorch AdaptiveAvgPool binning as an [out, in] averaging matrix."""
    rows = []
    for i in range(out_size):
        start = (i * in_size) // out_size
        end = -(-((i + 1) * in_size) // out_size)  # ceil
        row = jnp.zeros((in_size,), jnp.float32).at[start:end].set(1.0 / (end - start))
        rows.append(row)
    return jnp.stack(rows)


def _pad_axis(a, axis, new_size):
    pad = [(0, 0)] * a.ndim
    pad[axis] = (0, new_size - a.shape[axis])
    return jnp.pad(a, pad)


def _pad_heads(a, axis, n_head, dh, dh_pad):
    """Pad a hidden axis with per-head structure: each dh chunk -> dh_pad."""
    a = jnp.moveaxis(a, axis, -1)
    lead = a.shape[:-1]
    a = a.reshape(lead + (n_head, dh))
    a = jnp.pad(a, [(0, 0)] * len(lead) + [(0, 0), (0, dh_pad - dh)])
    a = a.reshape(lead + (n_head * dh_pad,))
    return jnp.moveaxis(a, -1, axis)


def prepare_params(params, *, input_size, hidden, vocab, dff, n_head, h, w):
    """One-time fold/pad/cast: done outside the jitted hot path."""
    c = input_size
    dh = hidden // n_head
    hp = _round_up(hidden, LANE)
    dp = _round_up(dff, LANE)
    vp = _round_up(vocab, LANE)
    dh_pad = hp // n_head if (hp % n_head == 0 and hp // n_head >= dh) else dh

    # ---- fold pool / conv / 3x3-mean / time-pool into one matrix -------------
    wk = params["conv_w"][:, :, 0]                                  # [hid, c, 5, 5]
    wpad = jnp.pad(wk, ((0, 0), (0, 0), (1, 1), (1, 1)))
    w_eff = sum(wpad[:, :, dy:dy + 5, dx:dx + 5]
                for dy in range(3) for dx in range(3)) / 9.0        # mean over 3x3 outputs
    ph = _adaptive_pool_matrix(h, 5)
    pw = _adaptive_pool_matrix(w, 5)
    w_comb = jnp.einsum("ocij,iy,jx->ocyx", w_eff, ph, pw)          # [hid, c, h, w]
    w_mat = w_comb.reshape(hidden, c * h * w).T                     # [chw, hid]
    w_time = jnp.tile(w_mat, (4, 1)) / 4.0                          # AvgPool1d(4) fold

    prep = {
        "w_front": _pad_axis(w_time, 1, hp).astype(jnp.bfloat16),
        "b_front": _pad_axis(params["conv_b"].reshape(1, hidden), 1, hp),
        "mask": _pad_axis(jnp.ones((1, hidden), jnp.float32), 1, hp),
        "fc_w": _pad_axis(_pad_axis(params["fc_w"], 0, hp), 1, vp).astype(jnp.bfloat16),
        "fc_b": _pad_axis(params["fc_b"].reshape(1, vocab), 1, vp),
        "layers": [],
    }

    scale = 1.0 / math.sqrt(dh)   # attention scale folded into Q proj
    for lp in params["layers"]:
        wq = _pad_axis(_pad_heads(lp["wq"] * scale, 1, n_head, dh, dh_pad), 0, hp)
        wk_ = _pad_axis(_pad_heads(lp["wk"], 1, n_head, dh, dh_pad), 0, hp)
        wv = _pad_axis(_pad_heads(lp["wv"], 1, n_head, dh, dh_pad), 0, hp)
        bq = _pad_heads((lp["bq"] * scale).reshape(1, hidden), 1, n_head, dh, dh_pad)
        bk = _pad_heads(lp["bk"].reshape(1, hidden), 1, n_head, dh, dh_pad)
        bv = _pad_heads(lp["bv"].reshape(1, hidden), 1, n_head, dh, dh_pad)
        prep["layers"].append({
            "wqkv": jnp.concatenate([wq, wk_, wv], axis=1).astype(jnp.bfloat16),
            "bqkv": jnp.concatenate([bq, bk, bv], axis=1),
            "wo": _pad_axis(_pad_heads(lp["wo"], 0, n_head, dh, dh_pad),
                            1, hp).astype(jnp.bfloat16),
            "bo": _pad_axis(lp["bo"].reshape(1, hidden), 1, hp),
            "ln1_g": _pad_axis(lp["ln1_g"].reshape(1, hidden), 1, hp),
            "ln1_b": _pad_axis(lp["ln1_b"].reshape(1, hidden), 1, hp),
            "w1": _pad_axis(_pad_axis(lp["w1"], 0, hp), 1, dp).astype(jnp.bfloat16),
            "b1": _pad_axis(lp["b1"].reshape(1, dff), 1, dp),
            "w2": _pad_axis(_pad_axis(lp["w2"], 0, dp), 1, hp).astype(jnp.bfloat16),
            "b2": _pad_axis(lp["b2"].reshape(1, hidden), 1, hp),
            "ln2_g": _pad_axis(lp["ln2_g"].reshape(1, hidden), 1, hp),
            "ln2_b": _pad_axis(lp["ln2_b"].reshape(1, hidden), 1, hp),
        })
    return prep, dh_pad


# ------------------------------ raw parameter init ------------------------------

def _init(key, shape, scale=0.02):
    return (scale * jax.random.normal(key, shape)).astype(jnp.float32)


def init_params(key, input_size, hidden, vocab, dff, n_layers):
    keys = iter(jax.random.split(key, 4 + 12 * n_layers))
    params = {
        "conv_w": _init(next(keys), (hidden, input_size, 1, 5, 5)),
        "conv_b": _init(next(keys), (hidden,)),
        "fc_w": _init(next(keys), (hidden, vocab)),
        "fc_b": _init(next(keys), (vocab,)),
        "layers": [],
    }
    for _ in range(n_layers):
        lp = {
            "wq": _init(next(keys), (hidden, hidden)), "bq": _init(next(keys), (hidden,)),
            "wk": _init(next(keys), (hidden, hidden)), "bk": _init(next(keys), (hidden,)),
            "wv": _init(next(keys), (hidden, hidden)), "bv": _init(next(keys), (hidden,)),
            "wo": _init(next(keys), (hidden, hidden)), "bo": _init(next(keys), (hidden,)),
            "ln1_g": jnp.ones((hidden,), jnp.float32),
            "ln1_b": jnp.zeros((hidden,), jnp.float32),
            "w1": _init(next(keys), (hidden, dff)), "b1": _init(next(keys), (dff,)),
            "w2": _init(next(keys), (dff, hidden)), "b2": _init(next(keys), (hidden,)),
            "ln2_g": jnp.ones((hidden,), jnp.float32),
            "ln2_b": jnp.zeros((hidden,), jnp.float32),
        }
        params["layers"].append(lp)
    return params


# ----------------------------------- main ---------------------------------------

if __name__ == "__main__":
    n, c, t, h, w = 2, 4, 8, 16, 16            # n c t h w
    hidden, vocab, dff, n_head, n_layers = 32, 16, 64, 4, 1

    key = jax.random.PRNGKey(0)
    k_x, k_p = jax.random.split(key)
    video_features = jax.random.normal(k_x, (n, c, t, h, w), jnp.float32)
    video_length = jnp.array([8, 6], jnp.int32)

    raw_params = init_params(k_p, c, hidden, vocab, dff, n_layers)
    prep, dh_pad = prepare_params(raw_params, input_size=c, hidden=hidden,
                                  vocab=vocab, dff=dff, n_head=n_head, h=h, w=w)

    logits, new_length = temporal_aux_header(
        video_features, video_length, prep,
        n_head=n_head, hidden=hidden, vocab=vocab, dh_pad=dh_pad)

    jax.block_until_ready(logits)
    jax.block_until_ready(new_length)
    assert logits.shape == (n, t // 4, vocab), logits.shape
    assert new_length.shape == (n,), new_length.shape
    print("KERNEL_OK")
</pallas_src>

<mosaic_0001>
module attributes {stable_mosaic.version = 11 : i64} {
  func.func @_matmul_bias_kernel(%arg0: i32, %arg1: i32, %arg2: i32, %arg3: memref<4x512xf32, #tpu.memory_space<vmem>>, %arg4: memref<512x128xbf16, #tpu.memory_space<vmem>>, %arg5: memref<1x128xf32, #tpu.memory_space<vmem>>, %arg6: memref<4x128xf32, #tpu.memory_space<vmem>>, %arg7: memref<4x128xf32, #tpu.memory_space<vmem>>) attributes {dimension_semantics = [#tpu.dimension_semantics<parallel>, #tpu.dimension_semantics<parallel>, #tpu.dimension_semantics<arbitrary>], iteration_bounds = array<i64: 1, 1, 8>, scalar_prefetch = 0 : i64, scratch_operands = 1 : i64, tpu.core_type = #tpu.core_type<tc>, window_params = [{transform_indices = @transform_0, window_bounds = array<i64: 4, 512>}, {transform_indices = @transform_1, window_bounds = array<i64: 512, 128>}, {transform_indices = @transform_2, window_bounds = array<i64: 1, 128>}, {transform_indices = @transform_3, window_bounds = array<i64: 4, 128>}]} {
    %c0_i32 = arith.constant 0 : i32
    %0 = arith.cmpi eq, %arg2, %c0_i32 : i32
    %1 = arith.extui %0 : i1 to i32
    %c0_i32_0 = arith.constant 0 : i32
    %2 = arith.cmpi ne, %1, %c0_i32_0 : i32
    scf.if %2 {
      %cst_9 = arith.constant 0.000000e+00 : f32
      %13 = vector.broadcast %cst_9 : f32 to vector<4x128xf32>
      %c0_10 = arith.constant 0 : index
      %c0_11 = arith.constant 0 : index
      %14 = vector.load %arg7[%c0_10, %c0_11] : memref<4x128xf32, #tpu.memory_space<vmem>>, vector<4x128xf32>
      tpu.vector_store %arg7[%c0_10, %c0_11], %13 {strides = array<i32>} : memref<4x128xf32, #tpu.memory_space<vmem>>, vector<4x128xf32>,
    } else {
    }
    %c0 = arith.constant 0 : index
    %c0_1 = arith.constant 0 : index
    %3 = vector.load %arg7[%c0, %c0_1] : memref<4x128xf32, #tpu.memory_space<vmem>>, vector<4x128xf32>
    %c0_2 = arith.constant 0 : index
    %c0_3 = arith.constant 0 : index
    %4 = vector.load %arg3[%c0_2, %c0_3] : memref<4x512xf32, #tpu.memory_space<vmem>>, vector<4x512xf32>
    %5 = arith.truncf %4 : vector<4x512xf32> to vector<4x512xbf16>
    %c0_4 = arith.constant 0 : index
    %c0_5 = arith.constant 0 : index
    %6 = vector.load %arg4[%c0_4, %c0_5] : memref<512x128xbf16, #tpu.memory_space<vmem>>, vector<512x128xbf16>
    %cst = arith.constant dense<0.000000e+00> : vector<4x128xf32>
    %7 = tpu.matmul %5, %6, %cst {dimension_numbers = #tpu.dot_dimension_numbers<[1], [0], [0], [1], [0, 0, 1, 1], [], []>} : vector<4x512xbf16>, vector<512x128xbf16>, vector<4x128xf32> -> vector<4x128xf32>
    %8 = arith.addf %3, %7 : vector<4x128xf32>
    %c0_6 = arith.constant 0 : index
    %c0_7 = arith.constant 0 : index
    %9 = vector.load %arg7[%c0_6, %c0_7] : memref<4x128xf32, #tpu.memory_space<vmem>>, vector<4x128xf32>
    tpu.vector_store %arg7[%c0_6, %c0_7], %8 {strides = array<i32>} : memref<4x128xf32, #tpu.memory_space<vmem>>, vector<4x128xf32>,
    %c7_i32 = arith.constant 7 : i32
    %10 = arith.cmpi eq, %arg2, %c7_i32 : i32
    %11 = arith.extui %10 : i1 to i32
    %c0_i32_8 = arith.constant 0 : i32
    %12 = arith.cmpi ne, %11, %c0_i32_8 : i32
    scf.if %12 {
      %c0_9 = arith.constant 0 : index
      %c0_10 = arith.constant 0 : index
      %13 = vector.load %arg7[%c0_9, %c0_10] : memref<4x128xf32, #tpu.memory_space<vmem>>, vector<4x128xf32>
      %c0_11 = arith.constant 0 : index
      %c0_12 = arith.constant 0 : index
      %14 = vector.load %arg5[%c0_11, %c0_12] : memref<1x128xf32, #tpu.memory_space<vmem>>, vector<1x128xf32>
      %15 = vector.broadcast %14 : vector<1x128xf32> to vector<4x128xf32>
      %16 = arith.addf %13, %15 : vector<4x128xf32>
      %c0_13 = arith.constant 0 : index
      %c0_14 = arith.constant 0 : index
      %17 = vector.load %arg6[%c0_13, %c0_14] : memref<4x128xf32, #tpu.memory_space<vmem>>, vector<4x128xf32>
      tpu.vector_store %arg6[%c0_13, %c0_14], %16 {strides = array<i32>} : memref<4x128xf32, #tpu.memory_space<vmem>>, vector<4x128xf32>,
    } else {
    }
    return
  }
  func.func @transform_0(%arg0: i32, %arg1: i32, %arg2: i32) -> (i32, i32) {
    %c0_i32 = arith.constant 0 : i32
    return %arg0, %arg2 : i32, i32
  }
  func.func @transform_1(%arg0: i32, %arg1: i32, %arg2: i32) -> (i32, i32) {
    %c0_i32 = arith.constant 0 : i32
    return %arg2, %arg1 : i32, i32
  }
  func.func @transform_2(%arg0: i32, %arg1: i32, %arg2: i32) -> (i32, i32) {
    %c0_i32 = arith.constant 0 : i32
    %c0_i32_0 = arith.constant 0 : i32
    return %c0_i32, %arg1 : i32, i32
  }
  func.func @transform_3(%arg0: i32, %arg1: i32, %arg2: i32) -> (i32, i32) {
    %c0_i32 = arith.constant 0 : i32
    return %arg0, %arg1 : i32, i32
  }
}

module attributes {stable_mosaic.version = 11 : i64} {
  func.func @_encoder_layer_kernel(%arg0: i32, %arg1: memref<1x2x128xf32, #tpu.memory_space<vmem>>, %arg2: memref<1x128xf32, #tpu.memory_space<vmem>>, %arg3: memref<128x384xbf16, #tpu.memory_space<vmem>>, %arg4: memref<1x384xf32, #tpu.memory_space<vmem>>, %arg5: memref<128x128xbf16, #tpu.memory_space<vmem>>, %arg6: memref<1x128xf32, #tpu.memory_space<vmem>>, %arg7: memref<1x128xf32, #tpu.memory_space<vmem>>, %arg8: memref<1x128xf32, #tpu.memory_space<vmem>>, %arg9: memref<128x128xbf16, #tpu.memory_space<vmem>>, %arg10: memref<1x128xf32, #tpu.memory_space<vmem>>, %arg11: memref<128x128xbf16, #tpu.memory_space<vmem>>, %arg12: memref<1x128xf32, #tpu.memory_space<vmem>>, %arg13: memref<1x128xf32, #tpu.memory_space<vmem>>, %arg14: memref<1x128xf32, #tpu.memory_space<vmem>>, %arg15: memref<1x2x128xf32, #tpu.memory_space<vmem>>) attributes {dimension_semantics = [#tpu.dimension_semantics<parallel>], iteration_bounds = array<i64: 2>, scalar_prefetch = 0 : i64, scratch_operands = 0 : i64, tpu.core_type = #tpu.core_type<tc>, window_params = [{transform_indices = @transform_0, window_bounds = array<i64: 1, 2, 128>}, {pipeline_mode = #tpu.pipeline_mode<synchronous>, transform_indices = @transform_1, window_bounds = array<i64: 1, 128>}, {pipeline_mode = #tpu.pipeline_mode<synchronous>, transform_indices = @transform_2, window_bounds = array<i64: 128, 384>}, {pipeline_mode = #tpu.pipeline_mode<synchronous>, transform_indices = @transform_3, window_bounds = array<i64: 1, 384>}, {pipeline_mode = #tpu.pipeline_mode<synchronous>, transform_indices = @transform_4, window_bounds = array<i64: 128, 128>}, {pipeline_mode = #tpu.pipeline_mode<synchronous>, transform_indices = @transform_5, window_bounds = array<i64: 1, 128>}, {pipeline_mode = #tpu.pipeline_mode<synchronous>, transform_indices = @transform_6, window_bounds = array<i64: 1, 128>}, {pipeline_mode = #tpu.pipeline_mode<synchronous>, transform_indices = @transform_7, window_bounds = array<i64: 1, 128>}, {pipeline_mode = #tpu.pipeline_mode<synchronous>, transform_indices = @transform_8, window_bounds = array<i64: 128, 128>}, {pipeline_mode = #tpu.pipeline_mode<synchronous>, transform_indices = @transform_9, window_bounds = array<i64: 1, 128>}, {pipeline_mode = #tpu.pipeline_mode<synchronous>, transform_indices = @transform_10, window_bounds = array<i64: 128, 128>}, {pipeline_mode = #tpu.pipeline_mode<synchronous>, transform_indices = @transform_11, window_bounds = array<i64: 1, 128>}, {pipeline_mode = #tpu.pipeline_mode<synchronous>, transform_indices = @transform_12, window_bounds = array<i64: 1, 128>}, {pipeline_mode = #tpu.pipeline_mode<synchronous>, transform_indices = @transform_13, window_bounds = array<i64: 1, 128>}, {transform_indices = @transform_14, window_bounds = array<i64: 1, 2, 128>}]} {
    %c0 = arith.constant 0 : index
    %c0_0 = arith.constant 0 : index
    %c0_1 = arith.constant 0 : index
    %0 = vector.load %arg1[%c0, %c0_0, %c0_1] : memref<1x2x128xf32, #tpu.memory_space<vmem>>, vector<1x2x128xf32>
    %1 = vector.shape_cast %0 : vector<1x2x128xf32> to vector<2x128xf32>
    %c0_2 = arith.constant 0 : index
    %c0_3 = arith.constant 0 : index
    %2 = vector.load %arg2[%c0_2, %c0_3] : memref<1x128xf32, #tpu.memory_space<vmem>>, vector<1x128xf32>
    %3 = arith.truncf %1 : vector<2x128xf32> to vector<2x128xbf16>
    %c0_4 = arith.constant 0 : index
    %c0_5 = arith.constant 0 : index
    %4 = vector.load %arg3[%c0_4, %c0_5] : memref<128x384xbf16, #tpu.memory_space<vmem>>, vector<128x384xbf16>
    %cst = arith.constant dense<0.000000e+00> : vector<2x384xf32>
    %5 = tpu.matmul %3, %4, %cst {dimension_numbers = #tpu.dot_dimension_numbers<[1], [0], [0], [1], [0, 0, 1, 1], [], []>} : vector<2x128xbf16>, vector<128x384xbf16>, vector<2x384xf32> -> vector<2x384xf32>
    %c0_6 = arith.constant 0 : index
    %c0_7 = arith.constant 0 : index
    %6 = vector.load %arg4[%c0_6, %c0_7] : memref<1x384xf32, #tpu.memory_space<vmem>>, vector<1x384xf32>
    %7 = vector.broadcast %6 : vector<1x384xf32> to vector<2x384xf32>
    %8 = arith.addf %5, %7 : vector<2x384xf32>
    %9 = vector.extract_strided_slice %8 {offsets = [0, 0], sizes = [2, 32], strides = [1, 1]} : vector<2x384xf32> to vector<2x32xf32>
    %10 = arith.truncf %9 : vector<2x32xf32> to vector<2x32xbf16>
    %11 = vector.extract_strided_slice %8 {offsets = [0, 128], sizes = [2, 32], strides = [1, 1]} : vector<2x384xf32> to vector<2x32xf32>
    %12 = arith.truncf %11 : vector<2x32xf32> to vector<2x32xbf16>
    %13 = vector.extract_strided_slice %8 {offsets = [0, 256], sizes = [2, 32], strides = [1, 1]} : vector<2x384xf32> to vector<2x32xf32>
    %14 = arith.truncf %13 : vector<2x32xf32> to vector<2x32xbf16>
    %cst_8 = arith.constant dense<0.000000e+00> : vector<2x2xf32>
    %15 = tpu.matmul %10, %12, %cst_8 {dimension_numbers = #tpu.dot_dimension_numbers<[1], [1], [0], [0], [0, 0, 1, 0], [], []>} : vector<2x32xbf16>, vector<2x32xbf16>, vector<2x2xf32> -> vector<2x2xf32>
    %cst_9 = arith.constant dense<0xFF800000> : vector<2xf32>
    %16 = vector.multi_reduction <maximumf>, %15, %cst_9 [1] : vector<2x2xf32> to vector<2xf32>
    %17 = vector.shape_cast %16 : vector<2xf32> to vector<2x1xf32>
    %18 = vector.broadcast %17 : vector<2x1xf32> to vector<2x2xf32>
    %19 = arith.subf %15, %18 : vector<2x2xf32>
    %20 = math.exp %19 : vector<2x2xf32>
    %cst_10 = arith.constant dense<0.000000e+00> : vector<2xf32>
    %21 = vector.multi_reduction <add>, %20, %cst_10 [1] : vector<2x2xf32> to vector<2xf32>
    %22 = vector.shape_cast %21 : vector<2xf32> to vector<2x1xf32>
    %23 = tpu.reciprocal %22 {approx = true} : vector<2x1xf32> -> vector<2x1xf32>
    %24 = vector.broadcast %23 : vector<2x1xf32> to vector<2x2xf32>
    %25 = arith.mulf %20, %24 : vector<2x2xf32>
    %26 = arith.truncf %25 : vector<2x2xf32> to vector<2x2xbf16>
    %cst_11 = arith.constant dense<0.000000e+00> : vector<2x32xf32>
    %27 = tpu.matmul %26, %14, %cst_11 {dimension_numbers = #tpu.dot_dimension_numbers<[1], [0], [0], [1], [0, 0, 1, 1], [], []>} : vector<2x2xbf16>, vector<2x32xbf16>, vector<2x32xf32> -> vector<2x32xf32>
    %28 = vector.extract_strided_slice %8 {offsets = [0, 32], sizes = [2, 32], strides = [1, 1]} : vector<2x384xf32> to vector<2x32xf32>
    %29 = arith.truncf %28 : vector<2x32xf32> to vector<2x32xbf16>
    %30 = vector.extract_strided_slice %8 {offsets = [0, 160], sizes = [2, 32], strides = [1, 1]} : vector<2x384xf32> to vector<2x32xf32>
    %31 = arith.truncf %30 : vector<2x32xf32> to vector<2x32xbf16>
    %32 = vector.extract_strided_slice %8 {offsets = [0, 288], sizes = [2, 32], strides = [1, 1]} : vector<2x384xf32> to vector<2x32xf32>
    %33 = arith.truncf %32 : vector<2x32xf32> to vector<2x32xbf16>
    %cst_12 = arith.constant dense<0.000000e+00> : vector<2x2xf32>
    %34 = tpu.matmul %29, %31, %cst_12 {dimension_numbers = #tpu.dot_dimension_numbers<[1], [1], [0], [0], [0, 0, 1, 0], [], []>} : vector<2x32xbf16>, vector<2x32xbf16>, vector<2x2xf32> -> vector<2x2xf32>
    %cst_13 = arith.constant dense<0xFF800000> : vector<2xf32>
    %35 = vector.multi_reduction <maximumf>, %34, %cst_13 [1] : vector<2x2xf32> to vector<2xf32>
    %36 = vector.shape_cast %35 : vector<2xf32> to vector<2x1xf32>
    %37 = vector.broadcast %36 : vector<2x1xf32> to vector<2x2xf32>
    %38 = arith.subf %34, %37 : vector<2x2xf32>
    %39 = math.exp %38 : vector<2x2xf32>
    %cst_14 = arith.constant dense<0.000000e+00> : vector<2xf32>
    %40 = vector.multi_reduction <add>, %39, %cst_14 [1] : vector<2x2xf32> to vector<2xf32>
    %41 = vector.shape_cast %40 : vector<2xf32> to vector<2x1xf32>
    %42 = tpu.reciprocal %41 {approx = true} : vector<2x1xf32> -> vector<2x1xf32>
    %43 = vector.broadcast %42 : vector<2x1xf32> to vector<2x2xf32>
    %44 = arith.mulf %39, %43 : vector<2x2xf32>
    %45 = arith.truncf %44 : vector<2x2xf32> to vector<2x2xbf16>
    %cst_15 = arith.constant dense<0.000000e+00> : vector<2x32xf32>
    %46 = tpu.matmul %45, %33, %cst_15 {dimension_numbers = #tpu.dot_dimension_numbers<[1], [0], [0], [1], [0, 0, 1, 1], [], []>} : vector<2x2xbf16>, vector<2x32xbf16>, vector<2x32xf32> -> vector<2x32xf32>
    %47 = vector.extract_strided_slice %8 {offsets = [0, 64], sizes = [2, 32], strides = [1, 1]} : vector<2x384xf32> to vector<2x32xf32>
    %48 = arith.truncf %47 : vector<2x32xf32> to vector<2x32xbf16>
    %49 = vector.extract_strided_slice %8 {offsets = [0, 192], sizes = [2, 32], strides = [1, 1]} : vector<2x384xf32> to vector<2x32xf32>
    %50 = arith.truncf %49 : vector<2x32xf32> to vector<2x32xbf16>
    %51 = vector.extract_strided_slice %8 {offsets = [0, 320], sizes = [2, 32], strides = [1, 1]} : vector<2x384xf32> to vector<2x32xf32>
    %52 = arith.truncf %51 : vector<2x32xf32> to vector<2x32xbf16>
    %cst_16 = arith.constant dense<0.000000e+00> : vector<2x2xf32>
    %53 = tpu.matmul %48, %50, %cst_16 {dimension_numbers = #tpu.dot_dimension_numbers<[1], [1], [0], [0], [0, 0, 1, 0], [], []>} : vector<2x32xbf16>, vector<2x32xbf16>, vector<2x2xf32> -> vector<2x2xf32>
    %cst_17 = arith.constant dense<0xFF800000> : vector<2xf32>
    %54 = vector.multi_reduction <maximumf>, %53, %cst_17 [1] : vector<2x2xf32> to vector<2xf32>
    %55 = vector.shape_cast %54 : vector<2xf32> to vector<2x1xf32>
    %56 = vector.broadcast %55 : vector<2x1xf32> to vector<2x2xf32>
    %57 = arith.subf %53, %56 : vector<2x2xf32>
    %58 = math.exp %57 : vector<2x2xf32>
    %cst_18 = arith.constant dense<0.000000e+00> : vector<2xf32>
    %59 = vector.multi_reduction <add>, %58, %cst_18 [1] : vector<2x2xf32> to vector<2xf32>
    %60 = vector.shape_cast %59 : vector<2xf32> to vector<2x1xf32>
    %61 = tpu.reciprocal %60 {approx = true} : vector<2x1xf32> -> vector<2x1xf32>
    %62 = vector.broadcast %61 : vector<2x1xf32> to vector<2x2xf32>
    %63 = arith.mulf %58, %62 : vector<2x2xf32>
    %64 = arith.truncf %63 : vector<2x2xf32> to vector<2x2xbf16>
    %cst_19 = arith.constant dense<0.000000e+00> : vector<2x32xf32>
    %65 = tpu.matmul %64, %52, %cst_19 {dimension_numbers = #tpu.dot_dimension_numbers<[1], [0], [0], [1], [0, 0, 1, 1], [], []>} : vector<2x2xbf16>, vector<2x32xbf16>, vector<2x32xf32> -> vector<2x32xf32>
    %66 = vector.extract_strided_slice %8 {offsets = [0, 96], sizes = [2, 32], strides = [1, 1]} : vector<2x384xf32> to vector<2x32xf32>
    %67 = arith.truncf %66 : vector<2x32xf32> to vector<2x32xbf16>
    %68 = vector.extract_strided_slice %8 {offsets = [0, 224], sizes = [2, 32], strides = [1, 1]} : vector<2x384xf32> to vector<2x32xf32>
    %69 = arith.truncf %68 : vector<2x32xf32> to vector<2x32xbf16>
    %70 = vector.extract_strided_slice %8 {offsets = [0, 352], sizes = [2, 32], strides = [1, 1]} : vector<2x384xf32> to vector<2x32xf32>
    %71 = arith.truncf %70 : vector<2x32xf32> to vector<2x32xbf16>
    %cst_20 = arith.constant dense<0.000000e+00> : vector<2x2xf32>
    %72 = tpu.matmul %67, %69, %cst_20 {dimension_numbers = #tpu.dot_dimension_numbers<[1], [1], [0], [0], [0, 0, 1, 0], [], []>} : vector<2x32xbf16>, vector<2x32xbf16>, vector<2x2xf32> -> vector<2x2xf32>
    %cst_21 = arith.constant dense<0xFF800000> : vector<2xf32>
    %73 = vector.multi_reduction <maximumf>, %72, %cst_21 [1] : vector<2x2xf32> to vector<2xf32>
    %74 = vector.shape_cast %73 : vector<2xf32> to vector<2x1xf32>
    %75 = vector.broadcast %74 : vector<2x1xf32> to vector<2x2xf32>
    %76 = arith.subf %72, %75 : vector<2x2xf32>
    %77 = math.exp %76 : vector<2x2xf32>
    %cst_22 = arith.constant dense<0.000000e+00> : vector<2xf32>
    %78 = vector.multi_reduction <add>, %77, %cst_22 [1] : vector<2x2xf32> to vector<2xf32>
    %79 = vector.shape_cast %78 : vector<2xf32> to vector<2x1xf32>
    %80 = tpu.reciprocal %79 {approx = true} : vector<2x1xf32> -> vector<2x1xf32>
    %81 = vector.broadcast %80 : vector<2x1xf32> to vector<2x2xf32>
    %82 = arith.mulf %77, %81 : vector<2x2xf32>
    %83 = arith.truncf %82 : vector<2x2xf32> to vector<2x2xbf16>
    %cst_23 = arith.constant dense<0.000000e+00> : vector<2x32xf32>
    %84 = tpu.matmul %83, %71, %cst_23 {dimension_numbers = #tpu.dot_dimension_numbers<[1], [0], [0], [1], [0, 0, 1, 1], [], []>} : vector<2x2xbf16>, vector<2x32xbf16>, vector<2x32xf32> -> vector<2x32xf32>
    %85 = tpu.concatenate %27, %46, %65, %84 in 1 : vector<2x32xf32>, vector<2x32xf32>, vector<2x32xf32>, vector<2x32xf32> -> vector<2x128xf32>
    %86 = arith.truncf %85 : vector<2x128xf32> to vector<2x128xbf16>
    %c0_24 = arith.constant 0 : index
    %c0_25 = arith.constant 0 : index
    %87 = vector.load %arg5[%c0_24, %c0_25] : memref<128x128xbf16, #tpu.memory_space<vmem>>, vector<128x128xbf16>
    %cst_26 = arith.constant dense<0.000000e+00> : vector<2x128xf32>
    %88 = tpu.matmul %86, %87, %cst_26 {dimension_numbers = #tpu.dot_dimension_numbers<[1], [0], [0], [1], [0, 0, 1, 1], [], []>} : vector<2x128xbf16>, vector<128x128xbf16>, vector<2x128xf32> -> vector<2x128xf32>
    %c0_27 = arith.constant 0 : index
    %c0_28 = arith.constant 0 : index
    %89 = vector.load %arg6[%c0_27, %c0_28] : memref<1x128xf32, #tpu.memory_space<vmem>>, vector<1x128xf32>
    %90 = vector.broadcast %89 : vector<1x128xf32> to vector<2x128xf32>
    %91 = arith.addf %88, %90 : vector<2x128xf32>
    %92 = arith.addf %91, %1 : vector<2x128xf32>
    %c0_29 = arith.constant 0 : index
    %c0_30 = arith.constant 0 : index
    %93 = vector.load %arg7[%c0_29, %c0_30] : memref<1x128xf32, #tpu.memory_space<vmem>>, vector<1x128xf32>
    %c0_31 = arith.constant 0 : index
    %c0_32 = arith.constant 0 : index
    %94 = vector.load %arg8[%c0_31, %c0_32] : memref<1x128xf32, #tpu.memory_space<vmem>>, vector<1x128xf32>
    %95 = vector.broadcast %2 : vector<1x128xf32> to vector<2x128xf32>
    %96 = arith.mulf %92, %95 : vector<2x128xf32>
    %cst_33 = arith.constant dense<0.000000e+00> : vector<2xf32>
    %97 = vector.multi_reduction <add>, %96, %cst_33 [1] : vector<2x128xf32> to vector<2xf32>
    %98 = vector.shape_cast %97 : vector<2xf32> to vector<2x1xf32>
    %cst_34 = arith.constant 3.200000e+01 : f32
    %99 = vector.broadcast %cst_34 : f32 to vector<2x1xf32>
    %100 = arith.divf %98, %99 : vector<2x1xf32>
    %101 = vector.broadcast %100 : vector<2x1xf32> to vector<2x128xf32>
    %102 = arith.subf %92, %101 : vector<2x128xf32>
    %103 = vector.broadcast %2 : vector<1x128xf32> to vector<2x128xf32>
    %104 = arith.mulf %102, %103 : vector<2x128xf32>
    %105 = arith.mulf %104, %104 : vector<2x128xf32>
    %cst_35 = arith.constant dense<0.000000e+00> : vector<2xf32>
    %106 = vector.multi_reduction <add>, %105, %cst_35 [1] : vector<2x128xf32> to vector<2xf32>
    %107 = vector.shape_cast %106 : vector<2xf32> to vector<2x1xf32>
    %cst_36 = arith.constant 3.200000e+01 : f32
    %108 = vector.broadcast %cst_36 : f32 to vector<2x1xf32>
    %109 = arith.divf %107, %108 : vector<2x1xf32>
    %cst_37 = arith.constant 9.99999974E-6 : f32
    %110 = vector.broadcast %cst_37 : f32 to vector<2x1xf32>
    %111 = arith.addf %109, %110 : vector<2x1xf32>
    %112 = math.rsqrt %111 : vector<2x1xf32>
    %113 = vector.broadcast %112 : vector<2x1xf32> to vector<2x128xf32>
    %114 = arith.mulf %104, %113 : vector<2x128xf32>
    %115 = vector.broadcast %93 : vector<1x128xf32> to vector<2x128xf32>
    %116 = arith.mulf %114, %115 : vector<2x128xf32>
    %117 = vector.broadcast %94 : vector<1x128xf32> to vector<2x128xf32>
    %118 = arith.addf %116, %117 : vector<2x128xf32>
    %119 = arith.truncf %118 : vector<2x128xf32> to vector<2x128xbf16>
    %c0_38 = arith.constant 0 : index
    %c0_39 = arith.constant 0 : index
    %120 = vector.load %arg9[%c0_38, %c0_39] : memref<128x128xbf16, #tpu.memory_space<vmem>>, vector<128x128xbf16>
    %cst_40 = arith.constant dense<0.000000e+00> : vector<2x128xf32>
    %121 = tpu.matmul %119, %120, %cst_40 {dimension_numbers = #tpu.dot_dimension_numbers<[1], [0], [0], [1], [0, 0, 1, 1], [], []>} : vector<2x128xbf16>, vector<128x128xbf16>, vector<2x128xf32> -> vector<2x128xf32>
    %c0_41 = arith.constant 0 : index
    %c0_42 = arith.constant 0 : index
    %122 = vector.load %arg10[%c0_41, %c0_42] : memref<1x128xf32, #tpu.memory_space<vmem>>, vector<1x128xf32>
    %123 = vector.broadcast %122 : vector<1x128xf32> to vector<2x128xf32>
    %124 = arith.addf %121, %123 : vector<2x128xf32>
    %cst_43 = arith.constant 0.000000e+00 : f32
    %125 = vector.broadcast %cst_43 : f32 to vector<2x128xf32>
    %126 = arith.maximumf %124, %125 : vector<2x128xf32>
    %127 = arith.truncf %126 : vector<2x128xf32> to vector<2x128xbf16>
    %c0_44 = arith.constant 0 : index
    %c0_45 = arith.constant 0 : index
    %128 = vector.load %arg11[%c0_44, %c0_45] : memref<128x128xbf16, #tpu.memory_space<vmem>>, vector<128x128xbf16>
    %cst_46 = arith.constant dense<0.000000e+00> : vector<2x128xf32>
    %129 = tpu.matmul %127, %128, %cst_46 {dimension_numbers = #tpu.dot_dimension_numbers<[1], [0], [0], [1], [0, 0, 1, 1], [], []>} : vector<2x128xbf16>, vector<128x128xbf16>, vector<2x128xf32> -> vector<2x128xf32>
    %c0_47 = arith.constant 0 : index
    %c0_48 = arith.constant 0 : index
    %130 = vector.load %arg12[%c0_47, %c0_48] : memref<1x128xf32, #tpu.memory_space<vmem>>, vector<1x128xf32>
    %131 = vector.broadcast %130 : vector<1x128xf32> to vector<2x128xf32>
    %132 = arith.addf %129, %131 : vector<2x128xf32>
    %133 = arith.addf %132, %118 : vector<2x128xf32>
    %c0_49 = arith.constant 0 : index
    %c0_50 = arith.constant 0 : index
    %134 = vector.load %arg13[%c0_49, %c0_50] : memref<1x128xf32, #tpu.memory_space<vmem>>, vector<1x128xf32>
    %c0_51 = arith.constant 0 : index
    %c0_52 = arith.constant 0 : index
    %135 = vector.load %arg14[%c0_51, %c0_52] : memref<1x128xf32, #tpu.memory_space<vmem>>, vector<1x128xf32>
    %136 = vector.broadcast %2 : vector<1x128xf32> to vector<2x128xf32>
    %137 = arith.mulf %133, %136 : vector<2x128xf32>
    %cst_53 = arith.constant dense<0.000000e+00> : vector<2xf32>
    %138 = vector.multi_reduction <add>, %137, %cst_53 [1] : vector<2x128xf32> to vector<2xf32>
    %139 = vector.shape_cast %138 : vector<2xf32> to vector<2x1xf32>
    %cst_54 = arith.constant 3.200000e+01 : f32
    %140 = vector.broadcast %cst_54 : f32 to vector<2x1xf32>
    %141 = arith.divf %139, %140 : vector<2x1xf32>
    %142 = vector.broadcast %141 : vector<2x1xf32> to vector<2x128xf32>
    %143 = arith.subf %133, %142 : vector<2x128xf32>
    %144 = vector.broadcast %2 : vector<1x128xf32> to vector<2x128xf32>
    %145 = arith.mulf %143, %144 : vector<2x128xf32>
    %146 = arith.mulf %145, %145 : vector<2x128xf32>
    %cst_55 = arith.constant dense<0.000000e+00> : vector<2xf32>
    %147 = vector.multi_reduction <add>, %146, %cst_55 [1] : vector<2x128xf32> to vector<2xf32>
    %148 = vector.shape_cast %147 : vector<2xf32> to vector<2x1xf32>
    %cst_56 = arith.constant 3.200000e+01 : f32
    %149 = vector.broadcast %cst_56 : f32 to vector<2x1xf32>
    %150 = arith.divf %148, %149 : vector<2x1xf32>
    %cst_57 = arith.constant 9.99999974E-6 : f32
    %151 = vector.broadcast %cst_57 : f32 to vector<2x1xf32>
    %152 = arith.addf %150, %151 : vector<2x1xf32>
    %153 = math.rsqrt %152 : vector<2x1xf32>
    %154 = vector.broadcast %153 : vector<2x1xf32> to vector<2x128xf32>
    %155 = arith.mulf %145, %154 : vector<2x128xf32>
    %156 = vector.broadcast %134 : vector<1x128xf32> to vector<2x128xf32>
    %157 = arith.mulf %155, %156 : vector<2x128xf32>
    %158 = vector.broadcast %135 : vector<1x128xf32> to vector<2x128xf32>
    %159 = arith.addf %157, %158 : vector<2x128xf32>
    %c0_58 = arith.constant 0 : index
    %c0_59 = arith.constant 0 : index
    %c0_60 = arith.constant 0 : index
    %160 = vector.load %arg15[%c0_58, %c0_59, %c0_60] : memref<1x2x128xf32, #tpu.memory_space<vmem>>, vector<1x2x128xf32>
    %161 = vector.shape_cast %160 : vector<1x2x128xf32> to vector<2x128xf32>
    %162 = vector.shape_cast %159 : vector<2x128xf32> to vector<1x2x128xf32>
    tpu.vector_store %arg15[%c0_58, %c0_59, %c0_60], %162 {strides = array<i32>} : memref<1x2x128xf32, #tpu.memory_space<vmem>>, vector<1x2x128xf32>,
    return
  }
  func.func @transform_0(%arg0: i32) -> (i32, i32, i32) {
    %c0_i32 = arith.constant 0 : i32
    %c0_i32_0 = arith.constant 0 : i32
    %c0_i32_1 = arith.constant 0 : i32
    return %arg0, %c0_i32, %c0_i32_0 : i32, i32, i32
  }
  func.func @transform_1(%arg0: i32) -> (i32, i32) {
    %c0_i32 = arith.constant 0 : i32
    %c0_i32_0 = arith.constant 0 : i32
    %c0_i32_1 = arith.constant 0 : i32
    return %c0_i32, %c0_i32_0 : i32, i32
  }
  func.func @transform_2(%arg0: i32) -> (i32, i32) {
    %c0_i32 = arith.constant 0 : i32
    %c0_i32_0 = arith.constant 0 : i32
    %c0_i32_1 = arith.constant 0 : i32
    return %c0_i32, %c0_i32_0 : i32, i32
  }
  func.func @transform_3(%arg0: i32) -> (i32, i32) {
    %c0_i32 = arith.constant 0 : i32
    %c0_i32_0 = arith.constant 0 : i32
    %c0_i32_1 = arith.constant 0 : i32
    return %c0_i32, %c0_i32_0 : i32, i32
  }
  func.func @transform_4(%arg0: i32) -> (i32, i32) {
    %c0_i32 = arith.constant 0 : i32
    %c0_i32_0 = arith.constant 0 : i32
    %c0_i32_1 = arith.constant 0 : i32
    return %c0_i32, %c0_i32_0 : i32, i32
  }
  func.func @transform_5(%arg0: i32) -> (i32, i32) {
    %c0_i32 = arith.constant 0 : i32
    %c0_i32_0 = arith.constant 0 : i32
    %c0_i32_1 = arith.constant 0 : i32
    return %c0_i32, %c0_i32_0 : i32, i32
  }
  func.func @transform_6(%arg0: i32) -> (i32, i32) {
    %c0_i32 = arith.constant 0 : i32
    %c0_i32_0 = arith.constant 0 : i32
    %c0_i32_1 = arith.constant 0 : i32
    return %c0_i32, %c0_i32_0 : i32, i32
  }
  func.func @transform_7(%arg0: i32) -> (i32, i32) {
    %c0_i32 = arith.constant 0 : i32
    %c0_i32_0 = arith.constant 0 : i32
    %c0_i32_1 = arith.constant 0 : i32
    return %c0_i32, %c0_i32_0 : i32, i32
  }
  func.func @transform_8(%arg0: i32) -> (i32, i32) {
    %c0_i32 = arith.constant 0 : i32
    %c0_i32_0 = arith.constant 0 : i32
    %c0_i32_1 = arith.constant 0 : i32
    return %c0_i32, %c0_i32_0 : i32, i32
  }
  func.func @transform_9(%arg0: i32) -> (i32, i32) {
    %c0_i32 = arith.constant 0 : i32
    %c0_i32_0 = arith.constant 0 : i32
    %c0_i32_1 = arith.constant 0 : i32
    return %c0_i32, %c0_i32_0 : i32, i32
  }
  func.func @transform_10(%arg0: i32) -> (i32, i32) {
    %c0_i32 = arith.constant 0 : i32
    %c0_i32_0 = arith.constant 0 : i32
    %c0_i32_1 = arith.constant 0 : i32
    return %c0_i32, %c0_i32_0 : i32, i32
  }
  func.func @transform_11(%arg0: i32) -> (i32, i32) {
    %c0_i32 = arith.constant 0 : i32
    %c0_i32_0 = arith.constant 0 : i32
    %c0_i32_1 = arith.constant 0 : i32
    return %c0_i32, %c0_i32_0 : i32, i32
  }
  func.func @transform_12(%arg0: i32) -> (i32, i32) {
    %c0_i32 = arith.constant 0 : i32
    %c0_i32_0 = arith.constant 0 : i32
    %c0_i32_1 = arith.constant 0 : i32
    return %c0_i32, %c0_i32_0 : i32, i32
  }
  func.func @transform_13(%arg0: i32) -> (i32, i32) {
    %c0_i32 = arith.constant 0 : i32
    %c0_i32_0 = arith.constant 0 : i32
    %c0_i32_1 = arith.constant 0 : i32
    return %c0_i32, %c0_i32_0 : i32, i32
  }
  func.func @transform_14(%arg0: i32) -> (i32, i32, i32) {
    %c0_i32 = arith.constant 0 : i32
    %c0_i32_0 = arith.constant 0 : i32
    %c0_i32_1 = arith.constant 0 : i32
    return %arg0, %c0_i32, %c0_i32_0 : i32, i32, i32
  }
}

module attributes {stable_mosaic.version = 11 : i64} {
  func.func @_matmul_bias_kernel(%arg0: i32, %arg1: i32, %arg2: i32, %arg3: memref<4x128xf32, #tpu.memory_space<vmem>>, %arg4: memref<128x128xbf16, #tpu.memory_space<vmem>>, %arg5: memref<1x128xf32, #tpu.memory_space<vmem>>, %arg6: memref<4x128xf32, #tpu.memory_space<vmem>>, %arg7: memref<4x128xf32, #tpu.memory_space<vmem>>) attributes {dimension_semantics = [#tpu.dimension_semantics<parallel>, #tpu.dimension_semantics<parallel>, #tpu.dimension_semantics<arbitrary>], iteration_bounds = array<i64: 1, 1, 1>, scalar_prefetch = 0 : i64, scratch_operands = 1 : i64, tpu.core_type = #tpu.core_type<tc>, window_params = [{transform_indices = @transform_0, window_bounds = array<i64: 4, 128>}, {transform_indices = @transform_1, window_bounds = array<i64: 128, 128>}, {transform_indices = @transform_2, window_bounds = array<i64: 1, 128>}, {transform_indices = @transform_3, window_bounds = array<i64: 4, 128>}]} {
    %c0_i32 = arith.constant 0 : i32
    %0 = arith.cmpi eq, %arg2, %c0_i32 : i32
    %1 = arith.extui %0 : i1 to i32
    %c0_i32_0 = arith.constant 0 : i32
    %2 = arith.cmpi ne, %1, %c0_i32_0 : i32
    scf.if %2 {
      %cst_10 = arith.constant 0.000000e+00 : f32
      %13 = vector.broadcast %cst_10 : f32 to vector<4x128xf32>
      %c0_11 = arith.constant 0 : index
      %c0_12 = arith.constant 0 : index
      %14 = vector.load %arg7[%c0_11, %c0_12] : memref<4x128xf32, #tpu.memory_space<vmem>>, vector<4x128xf32>
      tpu.vector_store %arg7[%c0_11, %c0_12], %13 {strides = array<i32>} : memref<4x128xf32, #tpu.memory_space<vmem>>, vector<4x128xf32>,
    } else {
    }
    %c0 = arith.constant 0 : index
    %c0_1 = arith.constant 0 : index
    %3 = vector.load %arg7[%c0, %c0_1] : memref<4x128xf32, #tpu.memory_space<vmem>>, vector<4x128xf32>
    %c0_2 = arith.constant 0 : index
    %c0_3 = arith.constant 0 : index
    %4 = vector.load %arg3[%c0_2, %c0_3] : memref<4x128xf32, #tpu.memory_space<vmem>>, vector<4x128xf32>
    %5 = arith.truncf %4 : vector<4x128xf32> to vector<4x128xbf16>
    %c0_4 = arith.constant 0 : index
    %c0_5 = arith.constant 0 : index
    %6 = vector.load %arg4[%c0_4, %c0_5] : memref<128x128xbf16, #tpu.memory_space<vmem>>, vector<128x128xbf16>
    %cst = arith.constant dense<0.000000e+00> : vector<4x128xf32>
    %7 = tpu.matmul %5, %6, %cst {dimension_numbers = #tpu.dot_dimension_numbers<[1], [0], [0], [1], [0, 0, 1, 1], [], []>} : vector<4x128xbf16>, vector<128x128xbf16>, vector<4x128xf32> -> vector<4x128xf32>
    %8 = arith.addf %3, %7 : vector<4x128xf32>
    %c0_6 = arith.constant 0 : index
    %c0_7 = arith.constant 0 : index
    %9 = vector.load %arg7[%c0_6, %c0_7] : memref<4x128xf32, #tpu.memory_space<vmem>>, vector<4x128xf32>
    tpu.vector_store %arg7[%c0_6, %c0_7], %8 {strides = array<i32>} : memref<4x128xf32, #tpu.memory_space<vmem>>, vector<4x128xf32>,
    %c0_i32_8 = arith.constant 0 : i32
    %10 = arith.cmpi eq, %arg2, %c0_i32_8 : i32
    %11 = arith.extui %10 : i1 to i32
    %c0_i32_9 = arith.constant 0 : i32
    %12 = arith.cmpi ne, %11, %c0_i32_9 : i32
    scf.if %12 {
      %c0_10 = arith.constant 0 : index
      %c0_11 = arith.constant 0 : index
      %13 = vector.load %arg7[%c0_10, %c0_11] : memref<4x128xf32, #tpu.memory_space<vmem>>, vector<4x128xf32>
      %c0_12 = arith.constant 0 : index
      %c0_13 = arith.constant 0 : index
      %14 = vector.load %arg5[%c0_12, %c0_13] : memref<1x128xf32, #tpu.memory_space<vmem>>, vector<1x128xf32>
      %15 = vector.broadcast %14 : vector<1x128xf32> to vector<4x128xf32>
      %16 = arith.addf %13, %15 : vector<4x128xf32>
      %c0_14 = arith.constant 0 : index
      %c0_15 = arith.constant 0 : index
      %17 = vector.load %arg6[%c0_14, %c0_15] : memref<4x128xf32, #tpu.memory_space<vmem>>, vector<4x128xf32>
      tpu.vector_store %arg6[%c0_14, %c0_15], %16 {strides = array<i32>} : memref<4x128xf32, #tpu.memory_space<vmem>>, vector<4x128xf32>,
    } else {
    }
    return
  }
  func.func @transform_0(%arg0: i32, %arg1: i32, %arg2: i32) -> (i32, i32) {
    %c0_i32 = arith.constant 0 : i32
    return %arg0, %arg2 : i32, i32
  }
  func.func @transform_1(%arg0: i32, %arg1: i32, %arg2: i32) -> (i32, i32) {
    %c0_i32 = arith.constant 0 : i32
    return %arg2, %arg1 : i32, i32
  }
  func.func @transform_2(%arg0: i32, %arg1: i32, %arg2: i32) -> (i32, i32) {
    %c0_i32 = arith.constant 0 : i32
    %c0_i32_0 = arith.constant 0 : i32
    return %c0_i32, %arg1 : i32, i32
  }
  func.func @transform_3(%arg0: i32, %arg1: i32, %arg2: i32) -> (i32, i32) {
    %c0_i32 = arith.constant 0 : i32
    return %arg0, %arg1 : i32, i32
  }
}

</mosaic_0001>

<bundles_post_ra>
// kernel: temporal_aux_header.3
= control target key start
LH: loop header
LB: loop body
LE: loop exit
PB: predicated region body
PF: predicated region fallthrough
CT: control target
= control target key end

     0   :  { %s930_s12 = smov 0   ;;  %s932_s13 = smov 0   ;;  %s1013_s0 = inlined_call_operand.vmem [shape: f32[4,4096], index: 0, kind: input, shape index: {}]   ;;  %s1014_s1 = inlined_call_operand.vmem [shape: bf16[4096,128], index: 1, kind: input, shape index: {}]   ;;  %s1015_s2 = inlined_call_operand.vmem [shape: f32[1,128], index: 2, kind: input, shape index: {}]   ;;  %s1016_s3 = inlined_call_operand.vmem [shape: f32[4,128], index: 3, kind: output, shape index: {}]  }
   0x1   :  { %s934_s14 = smov 0  }
   0x2 LB: > { %s25_s15 = sadd.s32 1, %s903_s13  ;;  %p739_p0 = scmp.ge.s32.totalorder %s907_s14, 1  ;;  %s907_s14 = sphi %s934_s14, %s13_s14   ;;  %s903_s13 = sphi %s932_s13, %s1018_s13   ;;  %s899_s12 = sphi %s930_s12, %s1017_s12  }
   0x3   : > { %p26_p1 = scmp.ge.s32.totalorder %s25_s15, 8  ;;  %p189_p2 = scmp.lt.s32.totalorder %s907_s14, 9 }
   0x5   : > { %s1020_s15 = smov (%p26_p1, %s25_s15), 0  ;;  %p190_p3 = pnand %p739_p0, %p189_p2 }
   0x6   : > { %s740_s16 = sshll.u32 (!%p190_p3), %s899_s12, 2  ;;  %s742_s17 = sshll.u32 (!%p190_p3), %s899_s12, 6 }
   0x7   : > { %193 = sbr.rel (%p190_p3) target bundleno = 289 (0x121), region = 32  ;;  %p233_p4 = scmp.lt.s32.totalorder (!%p190_p3), %s740_s16, 31 }
   0x8   : > { %p241_p5 = scmp.lt.s32.totalorder (!%p190_p3), %s742_s17, 511  ;;  %p744_p6 = scmp.ne.s32.totalorder (!%p190_p3), %s899_s12, 0 }
   0xe   : > { %s1022_s16 = smov (!%p233_p4, %s740_s16), 31  ;;  %s1024_s17 = smov (!%p241_p5, %s742_s17), 511 }
   0xf   : > { %s741_s18 = sshll.u32 %s1022_s16, 2  ;;  %s743_s22 = sshll.u32 %s1024_s17, 2  ;;  %v909_v0 = vmov (!%p744_p6), 0.0  }
  0x10   : > { %s955_s21 = scalar_lea.vmem %s1013_s0, %s741_s18  ;;  %s960_s25 = scalar_lea.vmem %s1014_s1, %s743_s22  ;;  %264 = vst [vmem:[#allocation2] sm:$0xf] (!%p744_p6), %v909_v0 }
  0x11   : > { %263 = sbr.rel (%p744_p6) target bundleno = 24 (0x18), region = 36 }
  0x18 PF: > { %v851_v1 = vld [vmem:[%s960_s25 + $0x40] sm:$0xff]   ;;  %v855_v5 = vld [vmem:[%s960_s25 + $0x48] sm:$0xff]   ;;  %v859_v9 = vld [vmem:[%s960_s25 + $0x50] sm:$0xff]   ;;  %p777_p7 = scmp.ne.s32.totalorder %s899_s12, 7 }
  0x19   : > { %v852_v2 = vld [vmem:[%s960_s25 + $0xc0] sm:$0xff]   ;;  %782 = vmatprep.subr.bf16.mxu0 %v851_v1  ;;  %v856_v6 = vld [vmem:[%s960_s25 + $0xc8] sm:$0xff]   ;;  %v860_v10 = vld [vmem:[%s960_s25 + $0xd0] sm:$0xff]  }
  0x1a   : > { %v853_v3 = vld [vmem:[%s960_s25] sm:$0xff]   ;;  %804 = vmatprep.subr.bf16.mxu1 %v852_v2  ;;  %v857_v7 = vld [vmem:[%s960_s25 + $0x8] sm:$0xff]   ;;  %v861_v11 = vld [vmem:[%s960_s25 + $0x10] sm:$0xff]  }
  0x1b   : > { %v854_v4 = vld [vmem:[%s960_s25 + $0x80] sm:$0xff]   ;;  %783 = vmatpush3.bf16.msra.mxu0 %v853_v3  ;;  %v858_v8 = vld [vmem:[%s960_s25 + $0x88] sm:$0xff]   ;;  %v862_v12 = vld [vmem:[%s960_s25 + $0x90] sm:$0xff]  }
  0x1c   : > { %805 = vmatpush3.bf16.msra.mxu1 %v854_v4  ;;  %784 = vmatprep.subr.bf16.mxu0 %v855_v5  ;;  %v863_v13 = vld [vmem:[%s960_s25 + $0x58] sm:$0xff]   ;;  %v867_v17 = vld [vmem:[%s960_s25 + $0x60] sm:$0xff]   ;;  %v871_v21 = vld [vmem:[%s960_s25 + $0x68] sm:$0xff]  }
  0x1d   : > { %806 = vmatprep.subr.bf16.mxu1 %v856_v6  ;;  %v864_v14 = vld [vmem:[%s960_s25 + $0xd8] sm:$0xff]   ;;  %v868_v18 = vld [vmem:[%s960_s25 + $0xe0] sm:$0xff]   ;;  %v872_v22 = vld [vmem:[%s960_s25 + $0xe8] sm:$0xff]  }
  0x1e   : > { %v865_v15 = vld [vmem:[%s960_s25 + $0x18] sm:$0xff]   ;;  %v869_v19 = vld [vmem:[%s960_s25 + $0x20] sm:$0xff]   ;;  %v873_v23 = vld [vmem:[%s960_s25 + $0x28] sm:$0xff]  }
  0x1f   : > { %785 = vmatpush3.bf16.msra.mxu0 %v857_v7  ;;  %v866_v16 = vld [vmem:[%s960_s25 + $0x98] sm:$0xff]   ;;  %v870_v20 = vld [vmem:[%s960_s25 + $0xa0] sm:$0xff]   ;;  %v874_v24 = vld [vmem:[%s960_s25 + $0xa8] sm:$0xff]  }
  0x20   : > { %807 = vmatpush3.bf16.msra.mxu1 %v858_v8  ;;  %786 = vmatprep.subr.bf16.mxu0 %v859_v9  ;;  %v875_v25 = vld [vmem:[%s960_s25 + $0x70] sm:$0xff]   ;;  %v879_v29 = vld [vmem:[%s960_s25 + $0x78] sm:$0xff]   ;;  %v266_v33 = vld [vmem:[%s955_s21] sm:$0xff] }
  0x21   : > { %808 = vmatprep.subr.bf16.mxu1 %v860_v10  ;;  %v876_v26 = vld [vmem:[%s960_s25 + $0xf0] sm:$0xff]   ;;  %v880_v30 = vld [vmem:[%s960_s25 + $0xf8] sm:$0xff]   ;;  %v267_v34 = vld [vmem:[%s955_s21 + $0x8] sm:$0xff]  ;;  %v270_v35 = vcombine.high %v266_v33, %v266_v33  ;;  %v274_v37 = vpack.c.bf16 %v266_v33, %v266_v33 }
  0x22   : > { %v877_v27 = vld [vmem:[%s960_s25 + $0x30] sm:$0xff]   ;;  %v881_v31 = vld [vmem:[%s960_s25 + $0x38] sm:$0xff]   ;;  %v271_v36 = vcombine.high %v267_v34, %v267_v34  ;;  %v276_v38 = vpack.c.bf16 %v267_v34, %v267_v34  ;;  %v265_v49 = vld [vmem:[#allocation2] sm:$0xf] }
  0x23   : > { %787 = vmatpush3.bf16.msra.mxu0 %v861_v11  ;;  %v878_v28 = vld [vmem:[%s960_s25 + $0xb0] sm:$0xff]   ;;  %v882_v32 = vld [vmem:[%s960_s25 + $0xb8] sm:$0xff]   ;;  %v275_v39 = vpack.c.bf16 %v270_v35, %v270_v35  ;;  %v778_v55 = vld [vmem:[%s1015_s2] ss:$0 sm:$0xff] (!%p777_p7) }
  0x24   : > { %809 = vmatpush3.bf16.msra.mxu1 %v862_v12  ;;  %788 = vmatprep.subr.bf16.mxu0 %v863_v13  ;;  %v277_v40 = vpack.c.bf16 %v271_v36, %v271_v36 }
  0x25   : > { %810 = vmatprep.subr.bf16.mxu1 %v864_v14  ;;  %566 = vmatprep.mubr.bf16.mxu0 %v275_v39 }
  0x26   : > { %606 = vmatprep.mubr.bf16.mxu1 %v277_v40 }
  0x27   : > { %789 = vmatpush3.bf16.msra.mxu0 %v865_v15 }
  0x28   : > { %811 = vmatpush3.bf16.msra.mxu1 %v866_v16  ;;  %790 = vmatprep.subr.bf16.mxu0 %v867_v17 }
  0x29   : > { %812 = vmatprep.subr.bf16.mxu1 %v868_v18 }
  0x2b   : > { %791 = vmatpush3.bf16.msra.mxu0 %v869_v19 }
  0x2c   : > { %813 = vmatpush3.bf16.msra.mxu1 %v870_v20  ;;  %792 = vmatprep.subr.bf16.mxu0 %v871_v21 }
  0x2d   : > { %814 = vmatprep.subr.bf16.mxu1 %v872_v22 }
  0x2f   : > { %793 = vmatpush3.bf16.msra.mxu0 %v873_v23 }
  0x30   : > { %815 = vmatpush3.bf16.msra.mxu1 %v874_v24  ;;  %794 = vmatprep.subr.bf16.mxu0 %v875_v25 }
  0x31   : > { %816 = vmatprep.subr.bf16.mxu1 %v876_v26 }
  0x33   : > { %795 = vmatpush3.bf16.msra.mxu0 %v877_v27 }
  0x34   : > { %817 = vmatpush3.bf16.msra.mxu1 %v878_v28  ;;  %796 = vmatprep.subr.bf16.mxu0 %v879_v29 }
  0x35   : > { %818 = vmatprep.subr.bf16.mxu1 %v880_v30 }
  0x37   : > { %797 = vmatpush3.bf16.msra.mxu0 %v881_v31 }
  0x38   : > { %819 = vmatpush3.bf16.msra.mxu1 %v882_v32 }
  0x3a   : > { %567 = vmatmul.mubr.bf16.vlgmr.msra.gmra.mrb[0].mxu0 %v274_v37 }
  0x3b   : > { %607 = vmatmul.mubr.bf16.vlgmr.msra.gmra.mrb[0].mxu1 %v276_v38 }
 0x10d   : > { %v798_v41 = vpop.f32.mrb[0].mxu0 }
 0x10e   : > { %v820_v42 = vpop.f32.mrb[0].mxu1  ;;  %v799_v43 = vpop.f32.mrb[1].mxu0 }
 0x10f   : > { %v821_v44 = vpop.f32.mrb[1].mxu1  ;;  %v800_v45 = vadd.f32 %v799_v43, %v798_v41  ;;  %v801_v47 = vpop.f32.mrb[2].mxu0 }
 0x110   : > { %v822_v46 = vadd.f32 %v821_v44, %v820_v42  ;;  %v823_v48 = vpop.f32.mrb[2].mxu1  ;;  %v802_v50 = vpop.f32.mrb[3].mxu0  ;;  %619 = sbr.rel (%p777_p7) target bundleno = 289 (0x121), region = 40 }
 0x111   : > { %v824_v51 = vpop.f32.mrb[3].mxu1 }
 0x112   : > { %v609_v52 = vadd.f32 %v822_v46, %v800_v45 }
 0x114   : > { %v614_v53 = vadd.f32 %v609_v52, %v265_v49 }
 0x116   : > { %615 = vst [vmem:[#allocation2] sm:$0xf] %v614_v53 }
 0x11d   : > { %v620_v54 = vld [vmem:[#allocation2] sm:$0xf] }
 0x11e   : > { %v628_v56 = vadd.f32 %v778_v55, %v620_v54 }
 0x120   : > { %629 = vst [vmem:[%s1016_s3] sm:$0xf] %v628_v56 }
 0x121 PF: > { %s13_s14 = sadd.s32 1, %s907_s14   ;;  %s1017_s12 = smov %s903_s13 }
 0x122   : > { %p10_p8 = scmp.ge.s32.totalorder %s13_s14, 10   ;;  %s1018_s13 = smov %s1020_s15 }
 0x124   :  { %12 = sbr.rel (!%p10_p8) target bundleno = 2 (0x2), region = 76 }

// kernel: temporal_aux_header.4
= control target key start
LH: loop header
LB: loop body
LE: loop exit
PB: predicated region body
PF: predicated region fallthrough
CT: control target
= control target key end

     0   :  { %s2081_s29 = smov 0   ;;  %s2401_s0 = inlined_call_operand.vmem [shape: f32[2,2,128], index: 0, kind: input, shape index: {}]   ;;  %s2402_s1 = inlined_call_operand.vmem [shape: f32[1,128], index: 1, kind: input, shape index: {}]   ;;  %s2403_s2 = inlined_call_operand.vmem [shape: bf16[128,384], index: 2, kind: input, shape index: {}]   ;;  %s2404_s3 = inlined_call_operand.vmem [shape: f32[1,384], index: 3, kind: input, shape index: {}]   ;;  %s2405_s4 = inlined_call_operand.vmem [shape: bf16[128,128], index: 4, kind: input, shape index: {}]   ;;  %s2406_s5 = inlined_call_operand.vmem [shape: f32[1,128], index: 5, kind: input, shape index: {}]   ;;  %s2407_s6 = inlined_call_operand.vmem [shape: f32[1,128], index: 6, kind: input, shape index: {}]   ;;  %s2408_s7 = inlined_call_operand.vmem [shape: f32[1,128], index: 7, kind: input, shape index: {}]   ;;  %s2409_s8 = inlined_call_operand.vmem [shape: bf16[128,128], index: 8, kind: input, shape index: {}]   ;;  %s2410_s9 = inlined_call_operand.vmem [shape: f32[1,128], index: 9, kind: input, shape index: {}]   ;;  %s2411_s10 = inlined_call_operand.vmem [shape: bf16[128,128], index: 10, kind: input, shape index: {}]   ;;  %s2412_s11 = inlined_call_operand.vmem [shape: f32[1,128], index: 11, kind: input, shape index: {}]   ;;  %s2413_s12 = inlined_call_operand.vmem [shape: f32[1,128], index: 12, kind: input, shape index: {}]   ;;  %s2414_s13 = inlined_call_operand.vmem [shape: f32[1,128], index: 13, kind: input, shape index: {}]   ;;  %s2415_s14 = inlined_call_operand.vmem [shape: f32[2,2,128], index: 14, kind: output, shape index: {}]  }
   0x1 LB: > { %s1649_s30 = sadd.s32 4294967295, %s1998_s29   ;;  %p1653_p0 = scmp.ge.s32.totalorder %s1998_s29, 1  ;;  %s1998_s29 = sphi %s2081_s29, %s24_s29  }
   0x2   : > { %p411_p1 = scmp.lt.s32.totalorder %s1998_s29, 3 }
   0x4   : > { %p412_p2 = pnand %p1653_p0, %p411_p1 }
   0x5   : > { %v1916_v0 = vld [vmem:[%s2403_s2 + $0x4] ss:$12 sps:$4 sm:$0xff] (!%p412_p2)   ;;  %v1918_v1 = vld [vmem:[%s2403_s2] ss:$12 sps:$4 sm:$0xff] (!%p412_p2)   ;;  %v2000_v2 = vmov (!%p412_p2), 0   ;;  %v2001_v4 = vmov (!%p412_p2), 0.0   ;;  %v501_v28 = vlaneseq (!%p412_p2) }
   0x6   : > { %415 = sbr.rel (%p412_p2) target bundleno = 2968 (0xb98), region = 76  ;;  %676 = vmatprep.mubr.bf16.mxu0 (!%p412_p2), %v2000_v2  ;;  %644 = vmatprep.subr.bf16.mxu0 (!%p412_p2), %v1916_v0  ;;  %v1919_v3 = vld [vmem:[%s2403_s2 + $0x1c] ss:$12 sps:$4 sm:$0xff] (!%p412_p2)   ;;  %v1921_v5 = vld [vmem:[%s2403_s2 + $0x18] ss:$12 sps:$4 sm:$0xff] (!%p412_p2)   ;;  %p455_p3 = scmp.lt.s32.totalorder (!%p412_p2), %s1649_s30, 1 }
   0x7   : > { %1774 = vmatprep.subr.bf16.mxu1 (!%p412_p2), %v2001_v4  ;;  %645 = vmatpush1.bf16.msra.mxu0 (!%p412_p2), %v1918_v1  ;;  %v1922_v6 = vld [vmem:[%s2403_s2 + $0x34] ss:$12 sps:$4 sm:$0xff] (!%p412_p2)   ;;  %v1924_v7 = vld [vmem:[%s2403_s2 + $0x30] ss:$12 sps:$4 sm:$0xff] (!%p412_p2)   ;;  %v1925_v8 = vld [vmem:[%s2403_s2 + $0x4c] ss:$12 sps:$4 sm:$0xff] (!%p412_p2)  }
   0x8   : > { %646 = vmatprep.subr.bf16.mxu0 (!%p412_p2), %v1919_v3  ;;  %v1927_v9 = vld [vmem:[%s2403_s2 + $0x48] ss:$12 sps:$4 sm:$0xff] (!%p412_p2)   ;;  %v1928_v11 = vld [vmem:[%s2403_s2 + $0x64] ss:$12 sps:$4 sm:$0xff] (!%p412_p2)   ;;  %v1941_v12 = vld [vmem:[%s2403_s2 + $0x20] ss:$12 sps:$4 sm:$0xff] (!%p412_p2)  }
   0x9   : > { %v1940_v10 = vld [vmem:[%s2403_s2 + $0x8] ss:$12 sps:$4 sm:$0xff] (!%p412_p2)   ;;  %v1930_v13 = vld [vmem:[%s2403_s2 + $0x60] ss:$12 sps:$4 sm:$0xff] (!%p412_p2)   ;;  %v1933_v15 = vld [vmem:[%s2403_s2 + $0x78] ss:$12 sps:$4 sm:$0xff] (!%p412_p2)  }
   0xa   : > { %1775 = vmatpush3.bf16.msra.mxu1 (!%p412_p2), %v1940_v10  ;;  %v1931_v14 = vld [vmem:[%s2403_s2 + $0x7c] ss:$12 sps:$4 sm:$0xff] (!%p412_p2)   ;;  %v1942_v16 = vld [vmem:[%s2403_s2 + $0x38] ss:$12 sps:$4 sm:$0xff] (!%p412_p2)   ;;  %v1934_v17 = vld [vmem:[%s2403_s2 + $0x94] ss:$12 sps:$4 sm:$0xff] (!%p412_p2)  }
   0xb   : > { %647 = vmatpush1.bf16.msra.mxu0 (!%p412_p2), %v1921_v5  ;;  %1776 = vmatprep.subr.bf16.mxu1 (!%p412_p2), %v2001_v4  ;;  %v1943_v18 = vld [vmem:[%s2403_s2 + $0x50] ss:$12 sps:$4 sm:$0xff] (!%p412_p2)   ;;  %v1937_v20 = vld [vmem:[%s2403_s2 + $0xac] ss:$12 sps:$4 sm:$0xff] (!%p412_p2)   ;;  %v1944_v21 = vld [vmem:[%s2403_s2 + $0x68] ss:$12 sps:$4 sm:$0xff] (!%p412_p2)  }
   0xc   : > { %648 = vmatprep.subr.bf16.mxu0 (!%p412_p2), %v1922_v6  ;;  %v1936_v19 = vld [vmem:[%s2403_s2 + $0x90] ss:$12 sps:$4 sm:$0xff] (!%p412_p2)   ;;  %v1939_v22 = vld [vmem:[%s2403_s2 + $0xa8] ss:$12 sps:$4 sm:$0xff] (!%p412_p2)   ;;  %v1945_v24 = vld [vmem:[%s2403_s2 + $0x80] ss:$12 sps:$4 sm:$0xff] (!%p412_p2)  }
   0xd   : > { %s2417_s30 = smov (!%p455_p3, %s1649_s30), 1  ;;  %v1946_v26 = vld [vmem:[%s2403_s2 + $0x98] ss:$12 sps:$4 sm:$0xff]   ;;  %v1947_v27 = vld [vmem:[%s2403_s2 + $0xb0] ss:$12 sps:$4 sm:$0xff]   ;;  %vm2002_vm0 = vmmov 0  }
   0xe   : > { %s1654_s23 = sshll.u32 %s2417_s30, 1  ;;  %1777 = vmatpush3.bf16.msra.mxu1 %v1941_v12  ;;  %1790 = vmatprep.mubr.msk.bf16.mxu1 %vm2002_vm0, %v2001_v4  ;;  %v502_v29 = vshrl.u32 %v501_v28, 7  ;;  %v499_v31 = vld [vmem:[%s2404_s3] sm:$0x7]  ;;  %vm728_vm1 = vcmask 261120   ;;  %s2004_s16 = smov 64  }
   0xf   : > { %649 = vmatpush1.bf16.msra.mxu0 %v1924_v7  ;;  %1778 = vmatprep.subr.bf16.mxu1 %v2001_v4  ;;  %s458_s15 = scalar_lea.vmem %s2401_s0, %s1654_s23  ;;  %s2005_s17 = smov 32   ;;  %vm792_vm2 = vcmask 1040384   ;;  %vm775_vm3 = vcmask 9216   ;;  %vm788_vm4 = vcmask 15360   ;;  %vm1182_vm5 = vcmask 523264  }
  0x10   : > { %650 = vmatprep.subr.bf16.mxu0 %v1925_v8  ;;  %v2164_v23 = vld [vmem:[%s458_s15] sm:$0x3]  ;;  %v507_v30 = vsub.s32 1, %v502_v29  ;;  %v503_v32 = vsub.s32 0, %v502_v29  ;;  %s2003_s15 = smov 96   ;;  %v511_v44 = vsub.s32 2, %v502_v29  ;;  %s462_s22 = scalar_lea.vmem %s2415_s14, %s1654_s23 }
  0x11   : > { %v466_v25 = vpack.c.bf16 %v2164_v23, %v2164_v23  ;;  %vm1184_vm6 = vcmask 785408   ;;  %vm1308_vm7 = vcmask 1041408  }
  0x12   : > { %1779 = vmatpush3.bf16.msra.mxu1 %v1942_v16  ;;  %v508_v33 = vrot.slane %v499_v31, %v507_v30  ;;  %v504_v34 = vrot.slane %v499_v31, %v503_v32  ;;  %v512_v45 = vrot.slane %v499_v31, %v511_v44 }
  0x13   : > { %651 = vmatpush1.bf16.msra.mxu0 %v1927_v9  ;;  %1780 = vmatprep.subr.bf16.mxu1 %v2001_v4 }
  0x14   : > { %652 = vmatprep.subr.bf16.mxu0 %v1928_v11 }
  0x16   : > { %1781 = vmatpush3.bf16.msra.mxu1 %v1943_v18 }
  0x17   : > { %653 = vmatpush1.bf16.msra.mxu0 %v1930_v13  ;;  %1782 = vmatprep.subr.bf16.mxu1 %v2001_v4 }
  0x18   : > { %654 = vmatprep.subr.bf16.mxu0 %v1931_v14 }
  0x1a   : > { %1783 = vmatpush3.bf16.msra.mxu1 %v1944_v21 }
  0x1b   : > { %655 = vmatpush1.bf16.msra.mxu0 %v1933_v15  ;;  %1784 = vmatprep.subr.bf16.mxu1 %v2001_v4 }
  0x1c   : > { %656 = vmatprep.subr.bf16.mxu0 %v1934_v17 }
  0x1e   : > { %1785 = vmatpush3.bf16.msra.mxu1 %v1945_v24 }
  0x1f   : > { %657 = vmatpush1.bf16.msra.mxu0 %v1936_v19  ;;  %1786 = vmatprep.subr.bf16.mxu1 %v2001_v4 }
  0x20   : > { %658 = vmatprep.subr.bf16.mxu0 %v1937_v20 }
  0x22   : > { %1787 = vmatpush3.bf16.msra.mxu1 %v1946_v26 }
  0x23   : > { %659 = vmatpush1.bf16.msra.mxu0 %v1939_v22  ;;  %1788 = vmatprep.subr.bf16.mxu1 %v2001_v4 }
  0x24   : > { %1818 = vmatprep.subr.bf16.mxu0 %v2001_v4 }
  0x26   : > { %677 = vmatmul.mubr.bf16.vlgmr.msra.gmra.mrb[0].mxu0 %v466_v25  ;;  %1789 = vmatpush3.bf16.msra.mxu1 %v1947_v27 }
  0x27   : > { %1794 = vmatprep.subr.bf16.mxu1 %v2001_v4  ;;  %1820 = vmatprep.mubr.msk.bf16.mxu0 %vm2002_vm0, %v2001_v4 }
  0x29   : > { %1791 = vmatmul.mubr.bf16.vlgmr.msra.gmra.mrb[0].mxu1 %v466_v25 }
  0x2a   : > { %1796 = vmatprep.mubr.msk.bf16.mxu1 %vm2002_vm0, %v2001_v4 }
  0xf9   : > { %v678_v35 = vpop.f32.mrb[0].mxu0 }
  0xfa   : > { %v680_v36 = vpop.f32.mrb[1].mxu0  ;;  %v679_v40 = vadd.f32 %v678_v35, %v504_v34 }
  0xfb   : > { %v681_v37 = vadd.f32 %v680_v36, %v508_v33  ;;  %v682_v38 = vpop.f32.mrb[2].mxu0 }
  0xfc   : > { %v683_v39 = vpop.f32.mrb[3].mxu0  ;;  %v725_v43 = vpack.c.bf16 %v679_v40, %v679_v40  ;;  %v719_v46 = vpop.f32.mrb[0].mxu1 }
  0xfd   : > { %v726_v41 = vpack.c.bf16 %v681_v37, %v681_v37  ;;  %v720_v47 = vadd.f32 %v719_v46, %v512_v45  ;;  %v1792_v48 = vpop.f32.mrb[1].mxu1 }
  0xfe   : > { %v722_v49 = vpop.f32.mrb[2].mxu1 }
  0xff   : > { %840 = vrot.lane.b32.xlu1 %v726_v41, %s2003_s15  ;;  %v733_v42 = vsel %vm728_vm1, %v726_v41, 0  ;;  %v2202_v50 = vpack.c.bf16 %v720_v47, %v720_v47  ;;  %v1793_v51 = vpop.f32.mrb[3].mxu1 }
 0x100   : > { %1795 = vmatpush3.bf16.xpose.msra.mxu1 %v733_v42 }
 0x101   : > { %1800 = vmatprep.subr.bf16.mxu1 %v2001_v4  ;;  %v794_v52 = vsel %vm792_vm2, %v2202_v50, 0 }
 0x103   : > { %837 = vrot.lane.b32.xlu1 %v725_v43, %s2003_s15 }
 0x107   : > { %949 = vrot.lane.b32.xlu1 %v725_v43, %s2004_s16  ;;  %1797 = vmatmul.mubr.msk.bf16.vlgmr.msra.gmra.mrb[4].mxu1 %vm728_vm1, %v725_v43 }
 0x108   : > { %1802 = vmatprep.mubr.msk.bf16.mxu1 %vm2002_vm0, %v2001_v4  ;;  %1801 = vmatpush3.bf16.msra.mxu1 %v794_v52 }
 0x109   : > { %1806 = vmatprep.subr.bf16.mxu1 %v2001_v4 }
 0x10b   : > { %1061 = vrot.lane.b32.xlu1 %v726_v41, %s2005_s17 }
 0x10f   : > { %1059 = vrot.lane.b32.xlu1 %v725_v43, %s2005_s17 }
 0x171   : > { %v841_v63 = vpop.permute.xlu1 %840 }
 0x172   : > { %v846_v11 = vsel %vm728_vm1, %v841_v63, 0 }
 0x175   : > { %v838_v0 = vpop.permute.xlu1 %837 }
 0x179   : > { %v950_v2 = vpop.permute.xlu1 %949 }
 0x17d   : > { %v1062_v6 = vpop.permute.xlu1 %1061 }
 0x17e   : > { %v1067_v9 = vsel %vm728_vm1, %v1062_v6, 0  ;;  %v1951_v6 = vld [vmem:[%s2405_s4 + $0x18] sm:$0xff]  }
 0x181   : > { %v1060_v12 = vpop.permute.xlu1 %1059 }
 0x1da   : > { %v769_v53 = vpop.f32.mrb[4].mxu1 }
 0x1db   : > { %v1798_v54 = vpop.f32.mrb[5].mxu1  ;;  %v776_v55 = vsel %vm775_vm3, %v769_v53, -inf }
 0x1dc   : > { %777 = vmax.xlane.f32.xlu0 %v776_v55  ;;  %v772_v56 = vpop.f32.mrb[6].mxu1 }
 0x1dd   : > { %v1799_v57 = vpop.f32.mrb[7].mxu1 }
 0x269   : > { %v778_v58 = vpop.xlane.xlu0 %777 }
 0x26a   : > { %v779_v59 = vsub.f32 %v769_v53, %v778_v58 }
 0x26c   : > { %v780_v60 = vmul.f32 1.442695, %v779_v59 }
 0x26e   : > { %1972 = vpow2.f32 %v780_v60 }
 0x278   : > { %v1973_v61 = vpop.eup %1972 }
 0x279   : > { %v782_v62 = vsel %vm775_vm3, %v1973_v61, 0.0 }
 0x27a   : > { %783 = vadd.xlane.f32.xlu0 %v782_v62 }
 0x290   : > { %951 = vrot.lane.b32.xlu0 %v726_v41, %s2004_s16 }
 0x307   : > { %v784_v1 = vpop.xlane.xlu0 %783 }
 0x308   : > { %1974 = vrcp.f32 %v784_v1 }
 0x30b   : > { %v952_v3 = vpop.permute.xlu0 %951 }
 0x30c   : > { %v957_v5 = vsel %vm728_vm1, %v952_v3, 0  ;;  %v1949_v3 = vld [vmem:[%s2405_s4 + $0x8] sm:$0xff]  }
 0x30d   : > { %1819 = vmatpush3.bf16.xpose.msra.mxu0 %v957_v5  ;;  %v1950_v5 = vld [vmem:[%s2405_s4 + $0x10] sm:$0xff]  }
 0x30e   : > { %1830 = vmatprep.subr.bf16.mxu0 %v2001_v4 }
 0x312   : > { %v1975_v7 = vpop.eup %1974 }
 0x313   : > { %v786_v8 = vmul.f32 %v1975_v7, %v1973_v61  ;;  %v1952_v7 = vld [vmem:[%s2405_s4 + $0x20] sm:$0xff]  }
 0x314   : > { %1821 = vmatmul.mubr.msk.bf16.vlgmr.msra.gmra.mrb[4].mxu0 %vm728_vm1, %v950_v2  ;;  %v1948_v2 = vld [vmem:[%s2405_s4] sm:$0xff]  }
 0x315   : > { %1831 = vmatpush3.bf16.xpose.msra.mxu0 %v1067_v9  ;;  %v787_v10 = vpack.c.bf16 %v786_v8, %v786_v8  ;;  %1832 = vmatprep.mubr.msk.bf16.mxu0 %vm2002_vm0, %v2001_v4  ;;  %v1953_v8 = vld [vmem:[%s2405_s4 + $0x28] sm:$0xff]   ;;  %v1954_v9 = vld [vmem:[%s2405_s4 + $0x30] sm:$0xff]  }
 0x316   : > { %1842 = vmatprep.subr.bf16.mxu0 %v2001_v4 }
 0x317   : > { %1803 = vmatmul.mubr.msk.bf16.vlgmr.msra.gmra.mrb[8].mxu1 %vm788_vm4, %v787_v10 }
 0x318   : > { %1807 = vmatpush3.bf16.xpose.msra.mxu1 %v846_v11  ;;  %1808 = vmatprep.mubr.msk.bf16.mxu1 %vm2002_vm0, %v2001_v4 }
 0x319   : > { %1812 = vmatprep.subr.bf16.mxu1 %v2001_v4 }
 0x31c   : > { %1833 = vmatmul.mubr.msk.bf16.vlgmr.msra.gmra.mrb[8].mxu0 %vm728_vm1, %v1060_v12 }
 0x31d   : > { %1858 = vmatprep.mubr.msk.bf16.mxu0 %vm2002_vm0, %v2001_v4  ;;  %1843 = vmatpush3.bf16.msra.mxu0 %v1948_v2  ;;  %v1699_v2 = vld [vmem:[%s2408_s7] ss:$0 sm:$0xff] }
 0x31e   : > { %1844 = vmatprep.subr.bf16.mxu0 %v2001_v4 }
 0x31f   : > { %1809 = vmatmul.mubr.msk.bf16.vlgmr.msra.gmra.mrb[12].mxu1 %vm728_vm1, %v838_v0 }
 0x320   : > { %1814 = vmatprep.mubr.msk.bf16.mxu1 %vm2002_vm0, %v2001_v4 }
 0x321   : > { %1845 = vmatpush3.bf16.msra.mxu0 %v1949_v3 }
 0x322   : > { %1846 = vmatprep.subr.bf16.mxu0 %v2001_v4 }
 0x325   : > { %1847 = vmatpush3.bf16.msra.mxu0 %v1950_v5 }
 0x326   : > { %1848 = vmatprep.subr.bf16.mxu0 %v2001_v4 }
 0x329   : > { %1849 = vmatpush3.bf16.msra.mxu0 %v1951_v6 }
 0x32a   : > { %1850 = vmatprep.subr.bf16.mxu0 %v2001_v4 }
 0x32d   : > { %1851 = vmatpush3.bf16.msra.mxu0 %v1952_v7  ;;  %v1970_v7 = vld [vmem:[%s2411_s10 + $0x30] sm:$0xff]  }
 0x32e   : > { %1852 = vmatprep.subr.bf16.mxu0 %v2001_v4 }
 0x331   : > { %1853 = vmatpush3.bf16.msra.mxu0 %v1953_v8  ;;  %v1971_v8 = vld [vmem:[%s2411_s10 + $0x38] sm:$0xff]  }
 0x332   : > { %1854 = vmatprep.subr.bf16.mxu0 %v2001_v4 }
 0x335   : > { %1855 = vmatpush3.bf16.msra.mxu0 %v1954_v9  ;;  %v1700_v9 = vld [vmem:[%s2410_s9] ss:$0 sm:$0xff] }
 0x336   : > { %1856 = vmatprep.subr.bf16.mxu0 %v2001_v4 }
 0x3e7   : > { %v993_v13 = vpop.f32.mrb[4].mxu0 }
 0x3e8   : > { %v1822_v14 = vpop.f32.mrb[5].mxu0  ;;  %v999_v15 = vsel %vm775_vm3, %v993_v13, -inf }
 0x3e9   : > { %1000 = vmax.xlane.f32.xlu0 %v999_v15  ;;  %v996_v16 = vpop.f32.mrb[6].mxu0  ;;  %v1955_v14 = vld [vmem:[%s2405_s4 + $0x38] sm:$0xff]  }
 0x3ea   : > { %v2229_v17 = vpop.f32.mrb[8].mxu1  ;;  %v1823_v18 = vpop.f32.mrb[7].mxu0  ;;  %1857 = vmatpush3.bf16.msra.mxu0 %v1955_v14 }
 0x3eb   : > { %v1804_v19 = vpop.f32.mrb[9].mxu1  ;;  %1882 = vmatprep.subr.bf16.mxu0 %v2001_v4 }
 0x3ec   : > { %v833_v20 = vpop.f32.mrb[10].mxu1 }
 0x3ed   : > { %v1805_v21 = vpop.f32.mrb[11].mxu1 }
 0x3ef   : > { %v1103_v22 = vpop.f32.mrb[8].mxu0 }
 0x3f0   : > { %v1834_v24 = vpop.f32.mrb[9].mxu0  ;;  %v1109_v32 = vsel %vm775_vm3, %v1103_v22, -inf }
 0x3f1   : > { %v1106_v25 = vpop.f32.mrb[10].mxu0 }
 0x3f2   : > { %v882_v26 = vpop.f32.mrb[12].mxu1  ;;  %v1835_v27 = vpop.f32.mrb[11].mxu0 }
 0x3f3   : > { %v1810_v28 = vpop.f32.mrb[13].mxu1  ;;  %v888_v29 = vsel %vm775_vm3, %v882_v26, -inf }
 0x3f4   : > { %889 = vmax.xlane.f32.xlu1 %v888_v29  ;;  %v885_v30 = vpop.f32.mrb[14].mxu1 }
 0x3f5   : > { %v1811_v31 = vpop.f32.mrb[15].mxu1 }
 0x3f8   : > { %1110 = vmax.xlane.f32.xlu1 %v1109_v32  ;;  %v1688_v32 = vld [vmem:[%s2406_s5] ss:$0 sm:$0xff] }
 0x476   : > { %v1001_v33 = vpop.xlane.xlu0 %1000 }
 0x477   : > { %v1002_v34 = vsub.f32 %v993_v13, %v1001_v33 }
 0x479   : > { %v1003_v35 = vmul.f32 1.442695, %v1002_v34 }
 0x47b   : > { %1976 = vpow2.f32 %v1003_v35 }
 0x481   : > { %v890_v36 = vpop.xlane.xlu1 %889 }
 0x482   : > { %v891_v37 = vsub.f32 %v882_v26, %v890_v36 }
 0x484   : > { %v892_v42 = vmul.f32 1.442695, %v891_v37 }
 0x485   : > { %v1977_v38 = vpop.eup %1976  ;;  %v1111_v39 = vpop.xlane.xlu1 %1110 }
 0x486   : > { %v1112_v40 = vsub.f32 %v1103_v22, %v1111_v39  ;;  %v1005_v41 = vsel %vm775_vm3, %v1977_v38, 0.0 }
 0x487   : > { %1006 = vadd.xlane.f32.xlu0 %v1005_v41  ;;  %v1956_v41 = vld [vmem:[%s2409_s8] sm:$0xff]  }
 0x488   : > { %v1113_v43 = vmul.f32 1.442695, %v1112_v40 }
 0x48a   : > { %1978 = vpow2.f32 %v1113_v43 }
 0x48b   : > { %1980 = vpow2.f32 %v892_v42  ;;  %v1957_v42 = vld [vmem:[%s2409_s8 + $0x8] sm:$0xff]  }
 0x494   : > { %v1979_v44 = vpop.eup %1978 }
 0x495   : > { %v1115_v45 = vsel %vm775_vm3, %v1979_v44, 0.0  ;;  %v1981_v46 = vpop.eup %1980 }
 0x496   : > { %1116 = vadd.xlane.f32.xlu1 %v1115_v45  ;;  %v894_v47 = vsel %vm775_vm3, %v1981_v46, 0.0 }
 0x49a   : > { %895 = vadd.xlane.f32.xlu1 %v894_v47 }
 0x49d   : > { %901 = vrot.lane.b32.xlu0 %v2202_v50, %s2003_s15 }
 0x4ab   : > { %1011 = vrot.lane.b32.xlu1 %v2202_v50, %s2004_s16 }
 0x4af   : > { %1121 = vrot.lane.b32.xlu1 %v2202_v50, %s2005_s17 }
 0x514   : > { %v1007_v48 = vpop.xlane.xlu0 %1006 }
 0x518   : > { %v902_v49 = vpop.permute.xlu0 %901 }
 0x519   : > { %v907_v51 = vsel %vm792_vm2, %v902_v49, 0  ;;  %v1959_v49 = vld [vmem:[%s2409_s8 + $0x18] sm:$0xff]  }
 0x51a   : > { %1813 = vmatpush3.bf16.msra.mxu1 %v907_v51  ;;  %v1960_v51 = vld [vmem:[%s2409_s8 + $0x20] sm:$0xff]  }
 0x51b   : > { %1824 = vmatprep.subr.bf16.mxu1 %v2001_v4 }
 0x523   : > { %v1117_v52 = vpop.xlane.xlu1 %1116 }
 0x527   : > { %v896_v53 = vpop.xlane.xlu1 %895 }
 0x528   : > { %1982 = vrcp.f32 %v896_v53  ;;  %v1962_v53 = vld [vmem:[%s2409_s8 + $0x30] sm:$0xff]  }
 0x529   : > { %1984 = vrcp.f32 %v1007_v48  ;;  %v1958_v48 = vld [vmem:[%s2409_s8 + $0x10] sm:$0xff]  }
 0x52a   : > { %1986 = vrcp.f32 %v1117_v52  ;;  %v1961_v52 = vld [vmem:[%s2409_s8 + $0x28] sm:$0xff]  }
 0x52b   : > { %v1012_v56 = vpop.permute.xlu1 %1011 }
 0x52c   : > { %v1017_v59 = vsel %vm792_vm2, %v1012_v56, 0  ;;  %v1965_v56 = vld [vmem:[%s2411_s10 + $0x8] sm:$0xff]  }
 0x52f   : > { %v1122_v60 = vpop.permute.xlu1 %1121 }
 0x530   : > { %v1127_v63 = vsel %vm792_vm2, %v1122_v60, 0 }
 0x532   : > { %v1983_v54 = vpop.eup %1982 }
 0x533   : > { %v898_v55 = vmul.f32 %v1983_v54, %v1981_v46  ;;  %v1985_v58 = vpop.eup %1984  ;;  %v1963_v54 = vld [vmem:[%s2409_s8 + $0x38] sm:$0xff]  }
 0x534   : > { %v1009_v50 = vmul.f32 %v1985_v58, %v1977_v38  ;;  %v1987_v62 = vpop.eup %1986  ;;  %v1967_v58 = vld [vmem:[%s2411_s10 + $0x18] sm:$0xff]  }
 0x535   : > { %v899_v57 = vpack.c.bf16 %v898_v55, %v898_v55  ;;  %v1119_v0 = vmul.f32 %v1987_v62, %v1979_v44  ;;  %v1964_v55 = vld [vmem:[%s2411_s10] sm:$0xff]  }
 0x536   : > { %v1010_v61 = vpack.c.bf16 %v1009_v50, %v1009_v50  ;;  %v1969_v50 = vld [vmem:[%s2411_s10 + $0x28] sm:$0xff]  }
 0x537   : > { %1815 = vmatmul.mubr.msk.bf16.vlgmr.msra.gmra.mrb[16].mxu1 %vm788_vm4, %v899_v57  ;;  %v1120_v1 = vpack.c.bf16 %v1119_v0, %v1119_v0  ;;  %v1966_v57 = vld [vmem:[%s2411_s10 + $0x10] sm:$0xff]   ;;  %v1698_v0 = vld [vmem:[%s2407_s6] ss:$0 sm:$0xff] }
 0x538   : > { %1825 = vmatpush3.bf16.msra.mxu1 %v1017_v59  ;;  %1826 = vmatprep.mubr.msk.bf16.mxu1 %vm2002_vm0, %v2001_v4  ;;  %v1968_v59 = vld [vmem:[%s2411_s10 + $0x20] sm:$0xff]  }
 0x539   : > { %1836 = vmatprep.subr.bf16.mxu1 %v2001_v4 }
 0x53f   : > { %1827 = vmatmul.mubr.msk.bf16.vlgmr.msra.gmra.mrb[20].mxu1 %vm788_vm4, %v1010_v61 }
 0x540   : > { %1837 = vmatpush3.bf16.msra.mxu1 %v1127_v63  ;;  %1838 = vmatprep.mubr.msk.bf16.mxu1 %vm2002_vm0, %v2001_v4 }
 0x541   : > { %1862 = vmatprep.subr.bf16.mxu1 %v2001_v4 }
 0x547   : > { %1839 = vmatmul.mubr.msk.bf16.vlgmr.msra.gmra.mrb[24].mxu1 %vm788_vm4, %v1120_v1 }
 0x548   : > { %1878 = vmatprep.mubr.msk.bf16.mxu1 %vm2002_vm0, %v2001_v4  ;;  %1863 = vmatpush3.bf16.msra.mxu1 %v1956_v41 }
 0x549   : > { %1864 = vmatprep.subr.bf16.mxu1 %v2001_v4 }
 0x54c   : > { %1865 = vmatpush3.bf16.msra.mxu1 %v1957_v42 }
 0x54d   : > { %1866 = vmatprep.subr.bf16.mxu1 %v2001_v4 }
 0x550   : > { %1867 = vmatpush3.bf16.msra.mxu1 %v1958_v48 }
 0x551   : > { %1868 = vmatprep.subr.bf16.mxu1 %v2001_v4 }
 0x554   : > { %1869 = vmatpush3.bf16.msra.mxu1 %v1959_v49 }
 0x555   : > { %1870 = vmatprep.subr.bf16.mxu1 %v2001_v4 }
 0x558   : > { %1871 = vmatpush3.bf16.msra.mxu1 %v1960_v51 }
 0x559   : > { %1872 = vmatprep.subr.bf16.mxu1 %v2001_v4 }
 0x55c   : > { %1873 = vmatpush3.bf16.msra.mxu1 %v1961_v52 }
 0x55d   : > { %1874 = vmatprep.subr.bf16.mxu1 %v2001_v4 }
 0x560   : > { %1875 = vmatpush3.bf16.msra.mxu1 %v1962_v53 }
 0x561   : > { %1876 = vmatprep.subr.bf16.mxu1 %v2001_v4 }
 0x564   : > { %1877 = vmatpush3.bf16.msra.mxu1 %v1963_v54 }
 0x60a   : > { %v943_v10 = vpop.f32.mrb[16].mxu1 }
 0x60b   : > { %1170 = vrot.lane.b32.xlu0 %v943_v10, %s2005_s17  ;;  %v1816_v11 = vpop.f32.mrb[17].mxu1 }
 0x60c   : > { %v946_v12 = vpop.f32.mrb[18].mxu1 }
 0x60d   : > { %v1817_v13 = vpop.f32.mrb[19].mxu1 }
 0x612   : > { %v1053_v15 = vpop.f32.mrb[20].mxu1 }
 0x613   : > { %1174 = vrot.lane.b32.xlu1 %v1053_v15, %s2004_s16  ;;  %v1828_v16 = vpop.f32.mrb[21].mxu1 }
 0x614   : > { %v1056_v18 = vpop.f32.mrb[22].mxu1 }
 0x615   : > { %v1829_v19 = vpop.f32.mrb[23].mxu1 }
 0x61a   : > { %v1163_v20 = vpop.f32.mrb[24].mxu1 }
 0x61b   : > { %1178 = vrot.lane.b32.xlu0 %v1163_v20, %s2003_s15  ;;  %v1840_v21 = vpop.f32.mrb[25].mxu1 }
 0x61c   : > { %v1166_v22 = vpop.f32.mrb[26].mxu1 }
 0x61d   : > { %v1841_v24 = vpop.f32.mrb[27].mxu1 }
 0x67d   : > { %v1171_v25 = vpop.permute.xlu0 %1170 }
 0x67e   : > { %v1181_v27 = vsel %vm728_vm1, %v2229_v17, %v1171_v25  ;;  %v2302_v17 = vld [vmem:[%s2402_s1] ss:$0 sm:$0xff] }
 0x685   : > { %v1175_v26 = vpop.permute.xlu1 %1174 }
 0x686   : > { %v1183_v28 = vsel %vm1182_vm5, %v1181_v27, %v1175_v26 }
 0x68d   : > { %v1179_v29 = vpop.permute.xlu0 %1178 }
 0x68e   : > { %v1185_v30 = vsel %vm1184_vm6, %v1183_v28, %v1179_v29 }
 0x68f   : > { %v1186_v31 = vpack.c.bf16 %v1185_v30, %v1185_v30 }
 0x691   : > { %1859 = vmatmul.mubr.bf16.vlgmr.msra.gmra.mrb[12].mxu0 %v1186_v31 }
 0x692   : > { %1898 = vmatprep.mubr.msk.bf16.mxu0 %vm2002_vm0, %v2001_v4  ;;  %1883 = vmatpush3.bf16.msra.mxu0 %v1964_v55 }
 0x693   : > { %1884 = vmatprep.subr.bf16.mxu0 %v2001_v4 }
 0x696   : > { %1885 = vmatpush3.bf16.msra.mxu0 %v1965_v56 }
 0x697   : > { %1886 = vmatprep.subr.bf16.mxu0 %v2001_v4 }
 0x69a   : > { %1887 = vmatpush3.bf16.msra.mxu0 %v1966_v57 }
 0x69b   : > { %1888 = vmatprep.subr.bf16.mxu0 %v2001_v4 }
 0x69e   : > { %1889 = vmatpush3.bf16.msra.mxu0 %v1967_v58 }
 0x69f   : > { %1890 = vmatprep.subr.bf16.mxu0 %v2001_v4 }
 0x6a2   : > { %1891 = vmatpush3.bf16.msra.mxu0 %v1968_v59 }
 0x6a3   : > { %1892 = vmatprep.subr.bf16.mxu0 %v2001_v4 }
 0x6a6   : > { %1893 = vmatpush3.bf16.msra.mxu0 %v1969_v50 }
 0x6a7   : > { %1894 = vmatprep.subr.bf16.mxu0 %v2001_v4 }
 0x6aa   : > { %1895 = vmatpush3.bf16.msra.mxu0 %v1970_v7 }
 0x6ab   : > { %1896 = vmatprep.subr.bf16.mxu0 %v2001_v4  ;;  %v1709_v4 = vld [vmem:[%s2412_s11] ss:$0 sm:$0xff] }
 0x6ae   : > { %1897 = vmatpush3.bf16.msra.mxu0 %v1971_v8 }
 0x764   : > { %v1292_v33 = vpop.f32.mrb[12].mxu0 }
 0x765   : > { %v1293_v34 = vadd.f32 %v1688_v32, %v1292_v33  ;;  %v1860_v35 = vpop.f32.mrb[13].mxu0 }
 0x766   : > { %v1295_v36 = vpop.f32.mrb[14].mxu0 }
 0x767   : > { %v1298_v37 = vadd.f32 %v1293_v34, %v2164_v23  ;;  %v1861_v38 = vpop.f32.mrb[15].mxu0 }
 0x769   : > { %v1307_v39 = vmul.f32 %v2302_v17, %v1298_v37 }
 0x76b   : > { %v1309_v40 = vsel %vm1308_vm7, %v1307_v39, 0.0  ;;  %v1719_v39 = vld [vmem:[%s2414_s13] ss:$0 sm:$0xff] }
 0x76c   : > { %1310 = vadd.xlane.f32.xlu1 %v1309_v40 }
 0x7f9   : > { %v1311_v23 = vpop.xlane.xlu1 %1310 }
 0x7fa   : > { %v1313_v43 = vmul.f32 0.03125, %v1311_v23 }
 0x7fc   : > { %v1314_v44 = vsub.f32 %v1298_v37, %v1313_v43  ;;  %v1718_v37 = vld [vmem:[%s2413_s12] ss:$0 sm:$0xff] }
 0x7fe   : > { %v1315_v45 = vmul.f32 %v2302_v17, %v1314_v44 }
 0x800   : > { %v1316_v46 = vmul.f32 %v1315_v45, %v1315_v45 }
 0x802   : > { %v1317_v47 = vsel %vm1308_vm7, %v1316_v46, 0.0 }
 0x803   : > { %1318 = vadd.xlane.f32.xlu0 %v1317_v47 }
 0x890   : > { %v1319_v60 = vpop.xlane.xlu0 %1318 }
 0x891   : > { %v1320_v61 = vmul.f32 0.03125, %v1319_v60 }
 0x893   : > { %v1321_v62 = vadd.f32 1e-05, %v1320_v61 }
 0x895   : > { %1988 = vrsqrt.f32 %v1321_v62 }
 0x89f   : > { %v1989_v63 = vpop.eup %1988 }
 0x8a0   : > { %v1323_v1 = vmul.f32 %v1989_v63, %v1315_v45 }
 0x8a2   : > { %v1330_v3 = vmul.f32 %v1698_v0, %v1323_v1 }
 0x8a4   : > { %v1337_v5 = vadd.f32 %v1699_v2, %v1330_v3 }
 0x8a6   : > { %v1338_v6 = vpack.c.bf16 %v1337_v5, %v1337_v5 }
 0x8a8   : > { %1879 = vmatmul.mubr.bf16.vlgmr.msra.gmra.mrb[28].mxu1 %v1338_v6 }
 0x97b   : > { %v1444_v10 = vpop.f32.mrb[28].mxu1 }
 0x97c   : > { %v1445_v11 = vadd.f32 %v1700_v9, %v1444_v10  ;;  %v1880_v12 = vpop.f32.mrb[29].mxu1 }
 0x97d   : > { %v1447_v13 = vpop.f32.mrb[30].mxu1 }
 0x97e   : > { %v1450_v14 = vmax.f32 %v1445_v11, 0.0  ;;  %v1881_v15 = vpop.f32.mrb[31].mxu1 }
 0x980   : > { %v1451_v16 = vpack.c.bf16 %v1450_v14, %v1450_v14 }
 0x982   : > { %1899 = vmatmul.mubr.bf16.vlgmr.msra.gmra.mrb[16].mxu0 %v1451_v16 }
 0xa55   : > { %v1557_v18 = vpop.f32.mrb[16].mxu0 }
 0xa56   : > { %v1558_v19 = vadd.f32 %v1709_v4, %v1557_v18  ;;  %v1900_v20 = vpop.f32.mrb[17].mxu0 }
 0xa57   : > { %v1560_v21 = vpop.f32.mrb[18].mxu0 }
 0xa58   : > { %v1563_v22 = vadd.f32 %v1558_v19, %v1337_v5  ;;  %v1901_v24 = vpop.f32.mrb[19].mxu0 }
 0xa5a   : > { %v1566_v25 = vmul.f32 %v2302_v17, %v1563_v22 }
 0xa5c   : > { %v1567_v26 = vsel %vm1308_vm7, %v1566_v25, 0.0 }
 0xa5d   : > { %1568 = vadd.xlane.f32.xlu0 %v1567_v26 }
 0xaea   : > { %v1569_v27 = vpop.xlane.xlu0 %1568 }
 0xaeb   : > { %v1570_v28 = vmul.f32 0.03125, %v1569_v27 }
 0xaed   : > { %v1571_v29 = vsub.f32 %v1563_v22, %v1570_v28 }
 0xaef   : > { %v1572_v30 = vmul.f32 %v2302_v17, %v1571_v29 }
 0xaf1   : > { %v1573_v31 = vmul.f32 %v1572_v30, %v1572_v30 }
 0xaf3   : > { %v1574_v32 = vsel %vm1308_vm7, %v1573_v31, 0.0 }
 0xaf4   : > { %1575 = vadd.xlane.f32.xlu1 %v1574_v32 }
 0xb81   : > { %v1576_v33 = vpop.xlane.xlu1 %1575 }
 0xb82   : > { %v1577_v34 = vmul.f32 0.03125, %v1576_v33 }
 0xb84   : > { %v1578_v35 = vadd.f32 1e-05, %v1577_v34 }
 0xb86   : > { %1990 = vrsqrt.f32 %v1578_v35 }
 0xb90   : > { %v1991_v36 = vpop.eup %1990 }
 0xb91   : > { %v1580_v38 = vmul.f32 %v1991_v36, %v1572_v30 }
 0xb93   : > { %v1587_v40 = vmul.f32 %v1718_v37, %v1580_v38 }
 0xb95   : > { %v1594_v17 = vadd.f32 %v1719_v39, %v1587_v40 }
 0xb97   : > { %1595 = vst [vmem:[%s462_s22] sm:$0x3] %v1594_v17 }
 0xb98 PF: > { %s24_s29 = sadd.s32 1, %s1998_s29  }
 0xb99   : > { %p21_p4 = scmp.ge.s32.totalorder %s24_s29, 4  }
 0xb9b   :  { %23 = sbr.rel (!%p21_p4) target bundleno = 1 (0x1), region = 106 }

// kernel: temporal_aux_header.5
= control target key start
LH: loop header
LB: loop body
LE: loop exit
PB: predicated region body
PF: predicated region fallthrough
CT: control target
= control target key end

     0   :  { %v230_v1 = vmov 0.0   ;;  %vm231_vm0 = vmmov 0   ;;  %s295_s0 = inlined_call_operand.vmem [shape: f32[4,128], index: 0, kind: input, shape index: {}]   ;;  %s296_s1 = inlined_call_operand.vmem [shape: bf16[128,128], index: 1, kind: input, shape index: {}]   ;;  %s297_s2 = inlined_call_operand.vmem [shape: f32[1,128], index: 2, kind: input, shape index: {}]   ;;  %s298_s3 = inlined_call_operand.hbm [shape: f32[4,128], index: 3, kind: output, shape index: {}]  }
   0x1   :  { %v198_v0 = vld [vmem:[%s296_s1] sm:$0xff]   ;;  %175 = vmatprep.subr.bf16.mxu0 %v230_v1  ;;  %20 = vst [vmem:[#allocation2] sm:$0xf] %v230_v1  ;;  %v199_v2 = vld [vmem:[%s296_s1 + $0x8] sm:$0xff]   ;;  %191 = vmatprep.mubr.msk.bf16.mxu0 %vm231_vm0, %v230_v1  ;;  %v200_v3 = vld [vmem:[%s296_s1 + $0x10] sm:$0xff]  }
   0x2   :  { %176 = vmatpush3.bf16.msra.mxu0 %v198_v0 }
   0x3   :  { %177 = vmatprep.subr.bf16.mxu0 %v230_v1 }
   0x6   :  { %178 = vmatpush3.bf16.msra.mxu0 %v199_v2 }
   0x7   :  { %179 = vmatprep.subr.bf16.mxu0 %v230_v1 }
   0x8   :  { %8 = vsyncpa [#allocation4], 0  ;;  %v201_v4 = vld [vmem:[%s296_s1 + $0x18] sm:$0xff]   ;;  %v202_v5 = vld [vmem:[%s296_s1 + $0x20] sm:$0xff]  }
   0x9   :  { %v203_v6 = vld [vmem:[%s296_s1 + $0x28] sm:$0xff]   ;;  %v204_v7 = vld [vmem:[%s296_s1 + $0x30] sm:$0xff]   ;;  %v205_v8 = vld [vmem:[%s296_s1 + $0x38] sm:$0xff]   ;;  %s232_s1 = smov [#allocation3]  }
   0xa   :  { %180 = vmatpush3.bf16.msra.mxu0 %v200_v3  ;;  %v22_v9 = vld [vmem:[%s295_s0] sm:$0xf]  ;;  %s149_s5 = sshll.u32 %s232_s1, 4  ;;  %s150_s5 = int_to_ptr.vmem [resolvable:$true] %s149_s5 }
   0xb   :  { %181 = vmatprep.subr.bf16.mxu0 %v230_v1  ;;  %v23_v10 = vpack.c.bf16 %v22_v9, %v22_v9  ;;  %v21_v11 = vld [vmem:[#allocation2] sm:$0xf]  ;;  %s206_s0 = scalar_lea.vmem %s150_s5, 64  ;;  %p211_p1 = scmp.lt.s32.totalorder %s150_s5, %s150_s5 }
   0xc   :  { %v165_v17 = vld [vmem:[%s297_s2] ss:$0 sm:$0xff]  ;;  %p207_p0 = scmp.ne.s32.totalorder %s150_s5, %s206_s0  ;;  %p212_p2 = scmp.lt.s32.totalorder %s206_s0, %s206_s0 }
   0xe   :  { %182 = vmatpush3.bf16.msra.mxu0 %v201_v4  ;;  %p213_p3 = por %p212_p2, %p211_p1 }
   0xf   :  { %183 = vmatprep.subr.bf16.mxu0 %v230_v1 }
  0x10   :  { %p214_p4 = pnand %p213_p3, %p207_p0 }
  0x12   :  { %184 = vmatpush3.bf16.msra.mxu0 %v202_v5 }
  0x13   :  { %185 = vmatprep.subr.bf16.mxu0 %v230_v1 }
  0x16   :  { %186 = vmatpush3.bf16.msra.mxu0 %v203_v6 }
  0x17   :  { %187 = vmatprep.subr.bf16.mxu0 %v230_v1 }
  0x1a   :  { %188 = vmatpush3.bf16.msra.mxu0 %v204_v7 }
  0x1b   :  { %189 = vmatprep.subr.bf16.mxu0 %v230_v1 }
  0x1e   :  { %190 = vmatpush3.bf16.msra.mxu0 %v205_v8 }
  0x21   :  { %192 = vmatmul.mubr.bf16.vlgmr.msra.gmra.mrb[0].mxu0 %v23_v10 }
  0xf4   :  { %v122_v12 = vpop.f32.mrb[0].mxu0 }
  0xf5   :  { %v128_v13 = vadd.f32 %v122_v12, %v21_v11  ;;  %v193_v14 = vpop.f32.mrb[1].mxu0 }
  0xf6   :  { %v125_v15 = vpop.f32.mrb[2].mxu0 }
  0xf7   :  { %129 = vst [vmem:[#allocation2] sm:$0xf] %v128_v13  ;;  %v194_v16 = vpop.f32.mrb[3].mxu0 }
  0xfe   :  { %v133_v18 = vld [vmem:[#allocation2] sm:$0xf] }
  0xff   :  { %v141_v19 = vadd.f32 %v165_v17, %v133_v18 }
 0x101   :  { %142 = vst [vmem:[#allocation3] sm:$0xf] %v141_v19 }
 0x102   :  { %217 = shalt.err (!%p214_p4)
}
 0x103   :  { %s218_s8 = scalar_lea.hbm %s298_s3, 64 }
 0x104   :  { %p219_p5 = scmp.ne.s32.totalorder %s298_s3, %s218_s8  ;;  %p222_p6 = scmp.lt.u32.totalorder %s218_s8, %s298_s3 }
 0x106   :  { %p224_p7 = pnand %p222_p6, %p219_p5 }
 0x108   :  { %227 = shalt.err (!%p224_p7)
}
 0x109   :  { %152 = dma.vmem_to_hbm [thread:$0]  %s150_s5, 64, %s298_s3, [#allocation4]  }
 0x10a   :  { %228 = dma.done.wait [#allocation4], 64  }
 0x10b   :  { %229 = vsyncadd [#allocation4], 4294967232 }
 0x10c   :  { %156 = vsyncpa [#allocation4], 1 }

</bundles_post_ra>
